<compile_context>
chip_gen: v7x
topology: tpu7x:2x2x1
jax: 0.10.0
libtpu: 0.0.40
codegen_flags: <defaults>
</compile_context>

<pallas_src>
import jax
import jax.numpy as jnp
from jax.experimental import pallas as pl
from jax.experimental.pallas import tpu as pltpu


def _fused_head_kernel(x_ref, w_ref, b_ref, o_ref):
    """One head per grid step: Linear -> ReLU -> L2Norm (feature dim)."""
    # x_ref: (1, B, K) bf16, w_ref: (1, K, N) bf16, b_ref: (1, 1, N) f32,
    # o_ref: (1, B, N) f32.  Whole K in one block -> no reduction bookkeeping.
    y = jnp.dot(x_ref[0], w_ref[0], preferred_element_type=jnp.float32)
    y = y + b_ref[0]                                  # bias add
    y = jnp.maximum(y, 0.0)                           # ReLU(inplace=True)
    ssq = jnp.sum(y * y, axis=1, keepdims=True)       # ||y||^2 along dim=1
    # Clamp (norm >= 1e-12) so an all-zero ReLU row doesn't produce NaN/Inf.
    inv = jax.lax.rsqrt(jnp.maximum(ssq, 1e-24))      # rsqrt -> EUP slot
    o_ref[0] = (y * inv).astype(o_ref.dtype)


def fused_fc_relu_l2norm(x, w, b):
    """x: [H, B, K] bf16, w: [H, K, N] bf16, b: [H, 1, N] f32 -> [H, B, N] f32."""
    H, B, K = x.shape
    _, _, N = w.shape
    cost = pl.CostEstimate(
        flops=2 * H * B * K * N,
        transcendentals=H * B,
        bytes_accessed=(x.size * x.dtype.itemsize
                        + w.size * w.dtype.itemsize
                        + b.size * b.dtype.itemsize
                        + H * B * N * 4),
    )
    return pl.pallas_call(
        _fused_head_kernel,
        out_shape=jax.ShapeDtypeStruct((H, B, N), jnp.float32),
        grid_spec=pltpu.PrefetchScalarGridSpec(
            num_scalar_prefetch=0,
            grid=(H,),
            in_specs=[
                pl.BlockSpec((1, B, K), lambda h: (h, 0, 0)),
                pl.BlockSpec((1, K, N), lambda h: (h, 0, 0)),
                pl.BlockSpec((1, 1, N), lambda h: (h, 0, 0)),
            ],
            out_specs=pl.BlockSpec((1, B, N), lambda h: (h, 0, 0)),
        ),
        compiler_params=pltpu.CompilerParams(
            dimension_semantics=("parallel",),
        ),
        cost_estimate=cost,
    )(x, w, b)


class LearnablePINSenetVggVox256:
    """JAX/Pallas port of the PyTorch module's head (face_fc / audio_fc)."""

    FACE_FEAT = 2048   # senet50 pooled feature, flattened
    AUDIO_FEAT = 4096  # VGGM penultimate feature
    EMB = 256          # keep a multiple of 128 (lane-dense output stores)

    def __init__(self, key, embedding_dim=256, training=True):
        assert embedding_dim % 128 == 0, "keep N lane-dense (multiple of 128)"
        self.embedding_dim = embedding_dim
        self.training = training
        kf_w, kf_b, ka_w, ka_b = jax.random.split(key, 4)

        # nn.Linear default init: U(-1/sqrt(fan_in), 1/sqrt(fan_in)); f32 master.
        fbound = 1.0 / (self.FACE_FEAT ** 0.5)
        abound = 1.0 / (self.AUDIO_FEAT ** 0.5)
        self.face_w = jax.random.uniform(
            kf_w, (self.FACE_FEAT, embedding_dim), jnp.float32, -fbound, fbound)
        self.face_b = jax.random.uniform(
            kf_b, (embedding_dim,), jnp.float32, -fbound, fbound)
        self.audio_w = jax.random.uniform(
            ka_w, (self.AUDIO_FEAT, embedding_dim), jnp.float32, -abound, abound)
        self.audio_b = jax.random.uniform(
            ka_b, (embedding_dim,), jnp.float32, -abound, abound)

        # Pre-pad / stack / cast once: [2, Kmax, N] bf16 weights, [2, 1, N] f32 bias.
        self.k_max = max(self.FACE_FEAT, self.AUDIO_FEAT)
        face_w_pad = jnp.zeros((self.k_max, embedding_dim), jnp.float32)
        face_w_pad = face_w_pad.at[: self.FACE_FEAT].set(self.face_w)
        self.w_stacked = jnp.stack([face_w_pad, self.audio_w], axis=0).astype(
            jnp.bfloat16)
        self.b_stacked = jnp.stack([self.face_b, self.audio_b], axis=0).reshape(
            2, 1, embedding_dim)

    def test(self):
        self.training = False

    def __call__(self, face_feat, audio_feat, tau=None):
        # face_feat: [B, 2048]  (= self.face_model(face).view(B, -1))
        # audio_feat: [B, 4096] (= self.audio_model(audio) features)
        B = face_feat.shape[0]
        face_pad = jnp.zeros((B, self.k_max), face_feat.dtype)
        face_pad = face_pad.at[:, : self.FACE_FEAT].set(face_feat)
        x = jnp.stack([face_pad, audio_feat], axis=0).astype(jnp.bfloat16)

        emb = fused_fc_relu_l2norm(x, self.w_stacked, self.b_stacked)
        face, audio = emb[0], emb[1]

        if self.training:
            positive_pairs = (face, audio)
            # TODO(synk): negative_pairs = CurriculumMining(positive_pairs, tau)
            return positive_pairs
        return (face, audio)


def _reference(face_feat, audio_feat, model):
    """f32 reference using the same bf16 rounding of inputs/weights."""
    def head(x, w, b):
        x32 = x.astype(jnp.bfloat16).astype(jnp.float32)
        w32 = w.astype(jnp.bfloat16).astype(jnp.float32)
        y = jnp.maximum(x32 @ w32 + b, 0.0)
        n = jnp.maximum(jnp.linalg.norm(y, axis=1, keepdims=True), 1e-12)
        return y / n
    return (head(face_feat, model.face_w, model.face_b),
            head(audio_feat, model.audio_w, model.audio_b))


if __name__ == "__main__":
    key = jax.random.PRNGKey(0)
    k_model, k_face, k_audio = jax.random.split(key, 3)

    B = 2
    model = LearnablePINSenetVggVox256(k_model, embedding_dim=256, training=True)

    # Synthetic backbone outputs (stand-ins for senet50 / VGGM features).
    face_feat = jax.random.normal(k_face, (B, model.FACE_FEAT), jnp.float32)
    audio_feat = jax.random.normal(k_audio, (B, model.AUDIO_FEAT), jnp.float32)

    face_emb, audio_emb = model(face_feat, audio_feat)
    jax.block_until_ready((face_emb, audio_emb))

    ref_face, ref_audio = _reference(face_feat, audio_feat, model)
    assert face_emb.shape == (B, 256) and audio_emb.shape == (B, 256)
    assert jnp.allclose(face_emb, ref_face, atol=1e-3, rtol=1e-3)
    assert jnp.allclose(audio_emb, ref_audio, atol=1e-3, rtol=1e-3)
    print("KERNEL_OK")
</pallas_src>

<mosaic_0001>
module attributes {stable_mosaic.version = 11 : i64} {
  func.func @_fused_head_kernel(%arg0: i32, %arg1: memref<1x2x4096xbf16, #tpu.memory_space<vmem>>, %arg2: memref<1x4096x256xbf16, #tpu.memory_space<vmem>>, %arg3: memref<1x1x256xf32, #tpu.memory_space<vmem>>, %arg4: memref<1x2x256xf32, #tpu.memory_space<vmem>>) attributes {dimension_semantics = [#tpu.dimension_semantics<parallel>], iteration_bounds = array<i64: 2>, scalar_prefetch = 0 : i64, scratch_operands = 0 : i64, tpu.core_type = #tpu.core_type<tc>, window_params = [{transform_indices = @transform_0, window_bounds = array<i64: 1, 2, 4096>}, {transform_indices = @transform_1, window_bounds = array<i64: 1, 4096, 256>}, {transform_indices = @transform_2, window_bounds = array<i64: 1, 1, 256>}, {transform_indices = @transform_3, window_bounds = array<i64: 1, 2, 256>}]} {
    %c0 = arith.constant 0 : index
    %c0_0 = arith.constant 0 : index
    %c0_1 = arith.constant 0 : index
    %0 = vector.load %arg1[%c0, %c0_0, %c0_1] : memref<1x2x4096xbf16, #tpu.memory_space<vmem>>, vector<1x2x4096xbf16>
    %1 = vector.shape_cast %0 : vector<1x2x4096xbf16> to vector<2x4096xbf16>
    %c0_2 = arith.constant 0 : index
    %c0_3 = arith.constant 0 : index
    %c0_4 = arith.constant 0 : index
    %2 = vector.load %arg2[%c0_2, %c0_3, %c0_4] : memref<1x4096x256xbf16, #tpu.memory_space<vmem>>, vector<1x4096x256xbf16>
    %3 = vector.shape_cast %2 : vector<1x4096x256xbf16> to vector<4096x256xbf16>
    %cst = arith.constant dense<0.000000e+00> : vector<2x256xf32>
    %4 = tpu.matmul %1, %3, %cst {dimension_numbers = #tpu.dot_dimension_numbers<[1], [0], [0], [1], [0, 0, 1, 1], [], []>} : vector<2x4096xbf16>, vector<4096x256xbf16>, vector<2x256xf32> -> vector<2x256xf32>
    %c0_5 = arith.constant 0 : index
    %c0_6 = arith.constant 0 : index
    %c0_7 = arith.constant 0 : index
    %5 = vector.load %arg3[%c0_5, %c0_6, %c0_7] : memref<1x1x256xf32, #tpu.memory_space<vmem>>, vector<1x1x256xf32>
    %6 = vector.shape_cast %5 : vector<1x1x256xf32> to vector<1x256xf32>
    %7 = vector.broadcast %6 : vector<1x256xf32> to vector<2x256xf32>
    %8 = arith.addf %4, %7 : vector<2x256xf32>
    %cst_8 = arith.constant 0.000000e+00 : f32
    %9 = vector.broadcast %cst_8 : f32 to vector<2x256xf32>
    %10 = arith.maximumf %8, %9 : vector<2x256xf32>
    %11 = arith.mulf %10, %10 : vector<2x256xf32>
    %cst_9 = arith.constant dense<0.000000e+00> : vector<2xf32>
    %12 = vector.multi_reduction <add>, %11, %cst_9 [1] : vector<2x256xf32> to vector<2xf32>
    %13 = vector.shape_cast %12 : vector<2xf32> to vector<2x1xf32>
    %cst_10 = arith.constant 1.000000e-24 : f32
    %14 = vector.broadcast %cst_10 : f32 to vector<2x1xf32>
    %15 = arith.maximumf %13, %14 : vector<2x1xf32>
    %16 = math.rsqrt %15 : vector<2x1xf32>
    %17 = vector.broadcast %16 : vector<2x1xf32> to vector<2x256xf32>
    %18 = arith.mulf %10, %17 : vector<2x256xf32>
    %c0_11 = arith.constant 0 : index
    %c0_12 = arith.constant 0 : index
    %c0_13 = arith.constant 0 : index
    %19 = vector.load %arg4[%c0_11, %c0_12, %c0_13] : memref<1x2x256xf32, #tpu.memory_space<vmem>>, vector<1x2x256xf32>
    %20 = vector.shape_cast %19 : vector<1x2x256xf32> to vector<2x256xf32>
    %21 = vector.shape_cast %18 : vector<2x256xf32> to vector<1x2x256xf32>
    tpu.vector_store %arg4[%c0_11, %c0_12, %c0_13], %21 {strides = array<i32>} : memref<1x2x256xf32, #tpu.memory_space<vmem>>, vector<1x2x256xf32>,
    return
  }
  func.func @transform_0(%arg0: i32) -> (i32, i32, i32) {
    %c0_i32 = arith.constant 0 : i32
    %c0_i32_0 = arith.constant 0 : i32
    %c0_i32_1 = arith.constant 0 : i32
    return %arg0, %c0_i32, %c0_i32_0 : i32, i32, i32
  }
  func.func @transform_1(%arg0: i32) -> (i32, i32, i32) {
    %c0_i32 = arith.constant 0 : i32
    %c0_i32_0 = arith.constant 0 : i32
    %c0_i32_1 = arith.constant 0 : i32
    return %arg0, %c0_i32, %c0_i32_0 : i32, i32, i32
  }
  func.func @transform_2(%arg0: i32) -> (i32, i32, i32) {
    %c0_i32 = arith.constant 0 : i32
    %c0_i32_0 = arith.constant 0 : i32
    %c0_i32_1 = arith.constant 0 : i32
    return %arg0, %c0_i32, %c0_i32_0 : i32, i32, i32
  }
  func.func @transform_3(%arg0: i32) -> (i32, i32, i32) {
    %c0_i32 = arith.constant 0 : i32
    %c0_i32_0 = arith.constant 0 : i32
    %c0_i32_1 = arith.constant 0 : i32
    return %arg0, %c0_i32, %c0_i32_0 : i32, i32, i32
  }
}

</mosaic_0001>

<bundles_post_ra>
// kernel: tpu_custom_call.1
= control target key start
LH: loop header
LB: loop body
LE: loop exit
PB: predicated region body
PF: predicated region fallthrough
CT: control target
= control target key end

     0   :  { %8 = vsyncpa [#allocation3], 0  ;;  %s6918_s0 = inlined_call_operand.hbm [shape: bf16[2,2,4096], index: 0, kind: input, shape index: {}]   ;;  %s6919_s1 = inlined_call_operand.hbm [shape: bf16[2,4096,256], index: 1, kind: input, shape index: {}]   ;;  %s6920_s2 = inlined_call_operand.hbm [shape: f32[2,1,256], index: 2, kind: input, shape index: {}]   ;;  %s6921_s3 = inlined_call_operand.hbm [shape: f32[2,2,256], index: 3, kind: output, shape index: {}]  }
   0x1   :  { %10 = vsyncpa [#allocation3 + $0x1], 0 }
   0x2   :  { %11 = vsyncpa [#allocation6], 0 }
   0x3   :  { %13 = vsyncpa [#allocation6 + $0x1], 0 }
   0x4   :  { %14 = vsyncpa [#allocation4], 0 }
   0x5   :  { %16 = vsyncpa [#allocation4 + $0x1], 0  ;;  %s6013_s12 = smov 0   ;;  %s6015_s13 = smov 0  }
   0x6   :  { %s6017_s14 = smov 0   ;;  %s6019_s15 = smov 0  }
   0x7 LB: > { %s6034_s16 = sadd.s32 4294967295, %s5984_s15   ;;  %s4392_s17 = sadd.s32 4294967294, %s5984_s15   ;;  %s5984_s15 = sphi %s6019_s15, %s6941_s15   ;;  %s5980_s14 = sphi %s6017_s14, %s6940_s14   ;;  %s5976_s13 = sphi %s6015_s13, %s6939_s13   ;;  %s5972_s12 = sphi %s6013_s12, %s6938_s12  }
   0x8   : > { %s6038_s18 = sadd.s32 1, %s5984_s15   ;;  %s29_s19 = sadd.s32 1, %s5980_s14 }
   0x9   : > { %s26_s20 = ssub.s32 %s5984_s15, %s6038_s18  ;;  %p36_p0 = scmp.ne.s32.totalorder %s5980_s14, %s5976_s13 }
   0xa   : > { %p27_p1 = scmp.eq.s32.totalorder %s26_s20, 0  ;;  %p37_p2 = scmp.eq.s32.totalorder %s5984_s15, 0 }
   0xb   : > { %p42_p3 = scmp.ne.s32.totalorder %s5976_s13, %s5972_s12  ;;  %p43_p4 = scmp.eq.s32.totalorder %s6034_s16, 0 }
   0xc   : > { %s6050_s21 = scalar_select %p27_p1, %s5980_s14, %s29_s19  }
   0xd   : > { %p38_p5 = por %p37_p2, %p36_p0  ;;  %p6052_p6 = por %p43_p4, %p42_p3 }
   0xe   : > { %p118_p7 = scmp.eq.s32.totalorder %s6034_s16, 1  ;;  %p124_p8 = scmp.eq.s32.totalorder %s4392_s17, 1 }
   0xf   : > { %s6925_s22 = scalar_select %p6052_p6, 1, 0 }
  0x10   : > { %p5013_p10 = scmp.lt.s32.totalorder %s5984_s15, 2  ;;  %p6059_p11 = por %p118_p7, %p36_p0 }
  0x11   : > { %p6063_p12 = por %p124_p8, %p42_p3  ;;  %s6068_s25 = sand.u32 1, %s5980_s14  }
  0x12   : > { %s6926_s23 = scalar_select %p6059_p11, 1, 0 }
  0x13   : > { %s6927_s24 = scalar_select %p6063_p12, 1, 0 }
  0x14   : > { %p6070_p13 = pnand %p5013_p10, %p38_p5  ;;  %s163_s27 = sand.u32 1, %s5984_s15  }
  0x15   : > { %s4398_s28 = sshll.u32 %s6068_s25, 12  ;;  %s4928_s29 = sshll.u32 %s5984_s15, 16 }
  0x16   : > { %s6928_s26 = scalar_select %p6070_p13, 1, 0 }
  0x17   : > { %s6080_s5 = scalar_lea.hbm %s6919_s1, %s4928_s29  ;;  %s167_s6 = scalar_lea.vmem [#allocation5], %s4398_s28 }
  0x18   : > { %s174_s7 = sshll.u32 %s167_s6, 4  ;;  %s6085_s8 = scalar_lea.sflag [#allocation6], %s163_s27  ;;  %s6082_s7 = int_to_ptr.vmem [resolvable:$true] %s174_s7 }
  0x19   : > { %s5824_s9 = scalar_lea.hbm %s6080_s5, 65536  ;;  %p6091_p2 = pneg %p6070_p13 }
  0x1a   : > { %p5825_p1 = scmp.ne.s32.totalorder %s6080_s5, %s5824_s9  ;;  %s5829_s19 = scalar_lea.hbm %s6919_s1, 131072 }
  0x1b   : > { %p5830_p5 = scmp.lt.u32.totalorder %s6080_s5, %s6919_s1  ;;  %p5831_p7 = scmp.lt.u32.totalorder %s5829_s19, %s5824_s9 }
  0x1c   : > { %p5827_p3 = pnand %p6091_p2, %p5825_p1  ;;  %p5833_p10 = scmp.lt.u32.totalorder %s5824_s9, %s6080_s5 }
  0x1d   : > { %p5832_p8 = por %p5831_p7, %p5830_p5 }
  0x1e   : > { %p5828_p4 = pneg %p5827_p3 }
  0x1f   : > { %p5834_p9 = por %p5833_p10, %p5832_p8 }
  0x21   : > { %p5835_p0 = pnand %p5834_p9, %p5828_p4 }
  0x23   : > { %5838 = shalt.err (!%p5835_p0)
}
  0x24   : > { %s5839_s27 = scalar_lea.vmem %s6082_s7, 65536  ;;  %s5986_s29 = smov [#allocation5]  }
  0x25   : > { %p5840_p1 = scmp.ne.s32.totalorder %s6082_s7, %s5839_s27  ;;  %s5844_s30 = sshll.u32 %s5986_s29, 4  ;;  %s5845_s30 = int_to_ptr.vmem [resolvable:$false] %s5844_s30 }
  0x26   : > { %s5846_s4 = scalar_lea.vmem %s5845_s30, 131072  ;;  %p5847_p11 = scmp.lt.s32.totalorder %s6082_s7, %s5845_s30 }
  0x27   : > { %p5842_p3 = pnand %p5840_p1, %p6091_p2  ;;  %p5848_p6 = scmp.lt.s32.totalorder %s5846_s4, %s5839_s27 }
  0x29   : > { %p5843_p12 = pneg %p5842_p3  ;;  %p5849_p5 = por %p5848_p6, %p5847_p11 }
  0x2b   : > { %p5850_p7 = pnand %p5849_p5, %p5843_p12 }
  0x2d   : > { %5853 = shalt.err (!%p5850_p7)
}
  0x2e   : > { %s5987_s6 = smov 128   ;;  %s5988_s9 = smov 8  }
  0x2f   : > { %5005 = dma.hbm_to_vmem [thread:$0]  (!%p6070_p13), %s6080_s5, 65536, %s6082_s7, %s6085_s8, %s5987_s6, %s5987_s6, %s5988_s9  }
  0x30   : > { %p201_p9 = scmp.lt.s32.totalorder %s5984_s15, 3  ;;  %s4395_s11 = sshll.u32 %s6068_s25, 5 }
  0x31   : > { %s4927_s17 = sshll.u32 %s5984_s15, 9  ;;  %p6930_p6 = scmp.ge.s32.totalorder %s5984_s15, 1 }
  0x32   : > { %s6127_s27 = scalar_lea.hbm %s6918_s0, %s4927_s17  ;;  %s148_s29 = scalar_lea.vmem [#allocation2], %s4395_s11 }
  0x33   : > { %p6120_p11 = pnand %p6930_p6, %p201_p9  ;;  %s156_s30 = sshll.u32 %s148_s29, 4  ;;  %s6129_s30 = int_to_ptr.vmem [resolvable:$true] %s156_s30 }
  0x34   : > { %s4401_s5 = sshll.u32 %s6068_s25, 1  ;;  %s145_s7 = scalar_lea.sflag [#allocation3], %s6068_s25 }
  0x35   : > { %s6931_s19 = scalar_select %p6120_p11, 1, 0 }
  0x36   : > { %s5854_s4 = scalar_lea.hbm %s6127_s27, 512  ;;  %s5859_s17 = scalar_lea.hbm %s6918_s0, 1024 }
  0x37   : > { %p5855_p12 = scmp.ne.s32.totalorder %s6127_s27, %s5854_s4  ;;  %p5860_p8 = scmp.lt.u32.totalorder %s6127_s27, %s6918_s0 }
  0x38   : > { %p5861_p10 = scmp.lt.u32.totalorder %s5859_s17, %s5854_s4  ;;  %p5863_p3 = scmp.lt.u32.totalorder %s5854_s4, %s6127_s27 }
  0x39   : > { %p5857_p0 = pnand %p5855_p12, %p6091_p2 }
  0x3a   : > { %p5862_p1 = por %p5861_p10, %p5860_p8 }
  0x3b   : > { %p5858_p4 = pneg %p5857_p0 }
  0x3c   : > { %p5864_p5 = por %p5863_p3, %p5862_p1 }
  0x3e   : > { %p5865_p7 = pnand %p5864_p5, %p5858_p4 }
  0x40   : > { %5868 = shalt.err (!%p5865_p7)
}
  0x41   : > { %s5869_s11 = scalar_lea.vmem %s6129_s30, 512  ;;  %s5989_s29 = smov [#allocation2]  }
  0x42   : > { %p5870_p9 = scmp.ne.s32.totalorder %s6129_s30, %s5869_s11  ;;  %s5874_s6 = sshll.u32 %s5989_s29, 4  ;;  %s5875_s6 = int_to_ptr.vmem [resolvable:$false] %s5874_s6 }
  0x43   : > { %s5876_s9 = scalar_lea.vmem %s5875_s6, 1024  ;;  %p5877_p0 = scmp.lt.s32.totalorder %s6129_s30, %s5875_s6 }
  0x44   : > { %p5872_p6 = pnand %p5870_p9, %p6091_p2  ;;  %p5878_p11 = scmp.lt.s32.totalorder %s5876_s9, %s5869_s11 }
  0x46   : > { %p5873_p12 = pneg %p5872_p6  ;;  %p5879_p8 = por %p5878_p11, %p5877_p0 }
  0x48   : > { %p5880_p10 = pnand %p5879_p8, %p5873_p12 }
  0x4a   : > { %5883 = shalt.err (!%p5880_p10)
}
  0x4b   : > { %5002 = dma.hbm_to_vmem [thread:$0]  (!%p6070_p13), %s6127_s27, 512, %s6129_s30, %s145_s7  }
  0x4c   : > { %s4929_s4 = sshll.u32 %s5984_s15, 5  ;;  %s188_s11 = scalar_lea.vmem [#allocation7], %s4401_s5 }
  0x4d   : > { %s6158_s28 = scalar_lea.hbm %s6920_s2, %s4929_s4  ;;  %s196_s29 = sshll.u32 %s188_s11, 4  ;;  %s197_s29 = int_to_ptr.vmem [resolvable:$true] %s196_s29 }
  0x4e   : > { %s5884_s6 = scalar_lea.hbm %s6158_s28, 32  ;;  %s5889_s7 = scalar_lea.hbm %s6920_s2, 64 }
  0x4f   : > { %p5885_p11 = scmp.ne.s32.totalorder %s6158_s28, %s5884_s6  ;;  %p5890_p3 = scmp.lt.u32.totalorder %s6158_s28, %s6920_s2 }
  0x50   : > { %p5891_p5 = scmp.lt.u32.totalorder %s5889_s7, %s5884_s6  ;;  %p5893_p9 = scmp.lt.u32.totalorder %s5884_s6, %s6158_s28 }
  0x51   : > { %p5887_p4 = pnand %p5885_p11, %p6091_p2 }
  0x52   : > { %p5892_p7 = por %p5891_p5, %p5890_p3 }
  0x53   : > { %p5888_p1 = pneg %p5887_p4 }
  0x54   : > { %p5894_p6 = por %p5893_p9, %p5892_p7 }
  0x56   : > { %p5895_p12 = pnand %p5894_p6, %p5888_p1 }
  0x58   : > { %5898 = shalt.err (!%p5895_p12)
}
  0x59   : > { %s5899_s25 = scalar_lea.vmem %s197_s29, 32  ;;  %s5990_s5 = smov [#allocation7]  }
  0x5a   : > { %p5900_p0 = scmp.ne.s32.totalorder %s197_s29, %s5899_s25  ;;  %s5904_s17 = sshll.u32 %s5990_s5, 4  ;;  %s5905_s17 = int_to_ptr.vmem [resolvable:$false] %s5904_s17 }
  0x5b   : > { %s5906_s20 = scalar_lea.vmem %s5905_s17, 64  ;;  %p5907_p11 = scmp.lt.s32.totalorder %s197_s29, %s5905_s17 }
  0x5c   : > { %p5902_p8 = pnand %p5900_p0, %p6091_p2  ;;  %p5908_p4 = scmp.lt.s32.totalorder %s5906_s20, %s5899_s25 }
  0x5e   : > { %p5903_p10 = pneg %p5902_p8  ;;  %p5909_p13 = por %p5908_p4, %p5907_p11 }
  0x60   : > { %p5910_p3 = pnand %p5909_p13, %p5903_p10 }
  0x62   : > { %5913 = shalt.err (!%p5910_p3)
}
  0x63   : > { %p6932_p5 = scmp.ne.s32.totalorder %s6928_s26, 0  ;;  %p6933_p1 = scmp.ne.s32.totalorder %s6931_s19, 0 }
  0x64   : > { %s6183_s10 = sand.u32 (!%p6933_p1), 1, %s5976_s13   ;;  %p6934_p13 = scmp.ne.s32.totalorder (!%p6933_p1), %s6925_s22, 0 }
  0x65   : > { %5008 = dma.hbm_to_vmem [thread:$0]  (!%p6932_p5), %s6158_s28, 32, %s197_s29, %s6085_s8  }
  0x66   : > { %205 = sbr.rel (%p6933_p1) target bundleno = 1023 (0x3ff), region = 32  ;;  %s4405_s11 = sshll.u32 (!%p6933_p1), %s6183_s10, 5 }
  0x67   : > { %s208_s6 = scalar_lea.sflag (!%p6933_p1), [#allocation3], %s6183_s10  ;;  %s6187_s27 = scalar_lea.vmem (!%p6933_p1), [#allocation2], %s4405_s11 }
  0x6d   : > { %5959 = dma.done.wait (%p6934_p13), %s208_s6, 512  }
  0x6e   : > { %5961 = vsyncadd (%p6934_p13), %s208_s6, 4294966784  ;;  %s216_s26 = sand.u32 1, %s6034_s16   ;;  %s4406_s8 = sshll.u32 %s6183_s10, 12 }
  0x6f   : > { %s217_s19 = scalar_lea.sflag [#allocation6], %s216_s26  ;;  %s6195_s28 = scalar_lea.vmem [#allocation5], %s4406_s8 }
  0x70   : > { %5963 = dma.done.wait (%p6934_p13), %s217_s19, 65568  }
  0x71   : > { %5965 = vsyncadd (%p6934_p13), %s217_s19, 4294901728  ;;  %v5050_v0 = vld [vmem:[%s6195_s28 + $0x4] ss:$8 sps:$4 sm:$0xff]   ;;  %v5054_v2 = vld [vmem:[%s6195_s28] ss:$8 sps:$4 sm:$0xff]   ;;  %v780_v36 = vlaneseq  ;;  %s4407_s22 = sshll.u32 %s6183_s10, 1 }
  0x72   : > { %v5052_v1 = vld [vmem:[%s6195_s28 + $0x804] ss:$8 sps:$4 sm:$0xff]   ;;  %3582 = vmatprep.subr.bf16.mxu1 %v5050_v0  ;;  %v5055_v3 = vld [vmem:[%s6195_s28 + $0x800] ss:$8 sps:$4 sm:$0xff]   ;;  %v5056_v4 = vld [vmem:[%s6195_s28 + $0x14] ss:$8 sps:$4 sm:$0xff]  }
  0x73   : > { %3910 = vmatprep.subr.bf16.mxu0 %v5052_v1  ;;  %3583 = vmatpush1.bf16.msra.mxu1 %v5054_v2  ;;  %v5058_v5 = vld [vmem:[%s6195_s28 + $0x814] ss:$8 sps:$4 sm:$0xff]   ;;  %v5060_v6 = vld [vmem:[%s6195_s28 + $0x10] ss:$8 sps:$4 sm:$0xff]   ;;  %v5062_v8 = vld [vmem:[%s6195_s28 + $0x24] ss:$8 sps:$4 sm:$0xff]  }
  0x74   : > { %3911 = vmatpush1.bf16.msra.mxu0 %v5055_v3  ;;  %3584 = vmatprep.subr.bf16.mxu1 %v5056_v4  ;;  %v5061_v7 = vld [vmem:[%s6195_s28 + $0x810] ss:$8 sps:$4 sm:$0xff]   ;;  %v5064_v9 = vld [vmem:[%s6195_s28 + $0x824] ss:$8 sps:$4 sm:$0xff]   ;;  %v5066_v10 = vld [vmem:[%s6195_s28 + $0x20] ss:$8 sps:$4 sm:$0xff]  }
  0x75   : > { %3912 = vmatprep.subr.bf16.mxu0 %v5058_v5  ;;  %v5067_v11 = vld [vmem:[%s6195_s28 + $0x820] ss:$8 sps:$4 sm:$0xff]   ;;  %v5068_v12 = vld [vmem:[%s6195_s28 + $0x34] ss:$8 sps:$4 sm:$0xff]   ;;  %v5072_v14 = vld [vmem:[%s6195_s28 + $0x30] ss:$8 sps:$4 sm:$0xff]  }
  0x76   : > { %v5070_v13 = vld [vmem:[%s6195_s28 + $0x834] ss:$8 sps:$4 sm:$0xff]   ;;  %v5073_v15 = vld [vmem:[%s6195_s28 + $0x830] ss:$8 sps:$4 sm:$0xff]   ;;  %v5074_v16 = vld [vmem:[%s6195_s28 + $0x44] ss:$8 sps:$4 sm:$0xff]  }
  0x77   : > { %3585 = vmatpush1.bf16.msra.mxu1 %v5060_v6  ;;  %v5076_v17 = vld [vmem:[%s6195_s28 + $0x844] ss:$8 sps:$4 sm:$0xff]   ;;  %v5078_v18 = vld [vmem:[%s6195_s28 + $0x40] ss:$8 sps:$4 sm:$0xff]   ;;  %v5080_v20 = vld [vmem:[%s6195_s28 + $0x54] ss:$8 sps:$4 sm:$0xff]  }
  0x78   : > { %3913 = vmatpush1.bf16.msra.mxu0 %v5061_v7  ;;  %3586 = vmatprep.subr.bf16.mxu1 %v5062_v8  ;;  %v5079_v19 = vld [vmem:[%s6195_s28 + $0x840] ss:$8 sps:$4 sm:$0xff]   ;;  %v5082_v21 = vld [vmem:[%s6195_s28 + $0x854] ss:$8 sps:$4 sm:$0xff]   ;;  %v5084_v22 = vld [vmem:[%s6195_s28 + $0x50] ss:$8 sps:$4 sm:$0xff]  }
  0x79   : > { %3914 = vmatprep.subr.bf16.mxu0 %v5064_v9  ;;  %v5085_v23 = vld [vmem:[%s6195_s28 + $0x850] ss:$8 sps:$4 sm:$0xff]   ;;  %v5086_v24 = vld [vmem:[%s6195_s28 + $0x64] ss:$8 sps:$4 sm:$0xff]   ;;  %v5090_v26 = vld [vmem:[%s6195_s28 + $0x60] ss:$8 sps:$4 sm:$0xff]  }
  0x7a   : > { %v5088_v25 = vld [vmem:[%s6195_s28 + $0x864] ss:$8 sps:$4 sm:$0xff]   ;;  %v5091_v27 = vld [vmem:[%s6195_s28 + $0x860] ss:$8 sps:$4 sm:$0xff]   ;;  %v5092_v28 = vld [vmem:[%s6195_s28 + $0x74] ss:$8 sps:$4 sm:$0xff]  }
  0x7b   : > { %3587 = vmatpush1.bf16.msra.mxu1 %v5066_v10  ;;  %v5094_v29 = vld [vmem:[%s6195_s28 + $0x874] ss:$8 sps:$4 sm:$0xff]   ;;  %v5096_v30 = vld [vmem:[%s6195_s28 + $0x70] ss:$8 sps:$4 sm:$0xff]   ;;  %v5098_v32 = vld [vmem:[%s6195_s28 + $0x84] ss:$8 sps:$4 sm:$0xff]  }
  0x7c   : > { %3915 = vmatpush1.bf16.msra.mxu0 %v5067_v11  ;;  %3588 = vmatprep.subr.bf16.mxu1 %v5068_v12  ;;  %v5097_v31 = vld [vmem:[%s6195_s28 + $0x870] ss:$8 sps:$4 sm:$0xff]   ;;  %v5100_v33 = vld [vmem:[%s6195_s28 + $0x884] ss:$8 sps:$4 sm:$0xff]   ;;  %v5102_v34 = vld [vmem:[%s6195_s28 + $0x80] ss:$8 sps:$4 sm:$0xff]  }
  0x7d   : > { %3916 = vmatprep.subr.bf16.mxu0 %v5070_v13  ;;  %v5103_v35 = vld [vmem:[%s6195_s28 + $0x880] ss:$8 sps:$4 sm:$0xff]   ;;  %v5991_v37 = vmov 1966171168   ;;  %v5104_v39 = vld [vmem:[%s6195_s28 + $0x94] ss:$8 sps:$4 sm:$0xff]  }
  0x7e   : > { %v796_v38 = vunpack.c.l.s4 %v5991_v37  ;;  %v5106_v40 = vld [vmem:[%s6195_s28 + $0x894] ss:$8 sps:$4 sm:$0xff]   ;;  %v5108_v41 = vld [vmem:[%s6195_s28 + $0x90] ss:$8 sps:$4 sm:$0xff]   ;;  %v6240_v42 = vshrl.u32 %v780_v36, 7  ;;  %v6253_v52 = vld [vmem:[%s6187_s27] sm:$0xff] }
  0x7f   : > { %3589 = vmatpush1.bf16.msra.mxu1 %v5072_v14  ;;  %v5109_v44 = vld [vmem:[%s6195_s28 + $0x890] ss:$8 sps:$4 sm:$0xff]   ;;  %v5110_v45 = vld [vmem:[%s6195_s28 + $0xa4] ss:$8 sps:$4 sm:$0xff]   ;;  %v5114_v47 = vld [vmem:[%s6195_s28 + $0xa0] ss:$8 sps:$4 sm:$0xff]  }
  0x80   : > { %3917 = vmatpush1.bf16.msra.mxu0 %v5073_v15  ;;  %3590 = vmatprep.subr.bf16.mxu1 %v5074_v16  ;;  %v797_v43 = vunpack.c.0.s8 %v796_v38  ;;  %v5112_v46 = vld [vmem:[%s6195_s28 + $0x8a4] ss:$8 sps:$4 sm:$0xff]   ;;  %v5115_v48 = vld [vmem:[%s6195_s28 + $0x8a0] ss:$8 sps:$4 sm:$0xff]   ;;  %v5116_v50 = vld [vmem:[%s6195_s28 + $0xb4] ss:$8 sps:$4 sm:$0xff]  }
  0x81   : > { %3918 = vmatprep.subr.bf16.mxu0 %v5076_v17  ;;  %v5118_v51 = vld [vmem:[%s6195_s28 + $0x8b4] ss:$8 sps:$4 sm:$0xff]   ;;  %v5120_v53 = vld [vmem:[%s6195_s28 + $0xb0] ss:$8 sps:$4 sm:$0xff]   ;;  %v5122_v57 = vld [vmem:[%s6195_s28 + $0xc4] ss:$8 sps:$4 sm:$0xff]  }
  0x82   : > { %v6248_v49 = vsub.s32 %v797_v43, %v6240_v42  ;;  %v5121_v55 = vld [vmem:[%s6195_s28 + $0x8b0] ss:$8 sps:$4 sm:$0xff]   ;;  %v5124_v58 = vld [vmem:[%s6195_s28 + $0x8c4] ss:$8 sps:$4 sm:$0xff]   ;;  %v5126_v63 = vld [vmem:[%s6195_s28 + $0xc0] ss:$8 sps:$4 sm:$0xff]  }
  0x83   : > { %3591 = vmatpush1.bf16.msra.mxu1 %v5078_v18  ;;  %v6260_v56 = vld [vmem:[%s6187_s27 + $0x10] sm:$0xff]  ;;  %v5127_v0 = vld [vmem:[%s6195_s28 + $0x8c0] ss:$8 sps:$4 sm:$0xff]   ;;  %v5134_v6 = vld [vmem:[%s6195_s28 + $0xe4] ss:$8 sps:$4 sm:$0xff]   ;;  %s229_s29 = scalar_lea.vmem [#allocation7], %s4407_s22 }
  0x84   : > { %3919 = vmatpush1.bf16.msra.mxu0 %v5079_v19  ;;  %3592 = vmatprep.subr.bf16.mxu1 %v5080_v20  ;;  %v801_v54 = vrot.slane %v6253_v52, %v6248_v49  ;;  %v899_v60 = vrot.slane %v6260_v56, %v6248_v49  ;;  %v5128_v1 = vld [vmem:[%s6195_s28 + $0xd4] ss:$8 sps:$4 sm:$0xff]   ;;  %v5132_v4 = vld [vmem:[%s6195_s28 + $0xd0] ss:$8 sps:$4 sm:$0xff]   ;;  %v5136_v7 = vld [vmem:[%s6195_s28 + $0x8e4] ss:$8 sps:$4 sm:$0xff]  }
  0x85   : > { %3920 = vmatprep.subr.bf16.mxu0 %v5082_v21  ;;  %v5130_v2 = vld [vmem:[%s6195_s28 + $0x8d4] ss:$8 sps:$4 sm:$0xff]   ;;  %v5133_v5 = vld [vmem:[%s6195_s28 + $0x8d0] ss:$8 sps:$4 sm:$0xff]   ;;  %v5138_v8 = vld [vmem:[%s6195_s28 + $0xe0] ss:$8 sps:$4 sm:$0xff]  }
  0x86   : > { %v809_v59 = vcombine.high %v801_v54, %v801_v54  ;;  %v907_v62 = vcombine.high %v899_v60, %v899_v60  ;;  %v5139_v9 = vld [vmem:[%s6195_s28 + $0x8e0] ss:$8 sps:$4 sm:$0xff]   ;;  %v5140_v10 = vld [vmem:[%s6195_s28 + $0xf4] ss:$8 sps:$4 sm:$0xff]   ;;  %v5144_v12 = vld [vmem:[%s6195_s28 + $0xf0] ss:$8 sps:$4 sm:$0xff]   ;;  %v6285_v16 = vrot.slane %v801_v54, %v6248_v49  ;;  %v6288_v17 = vrot.slane %v899_v60, %v6248_v49 }
  0x87   : > { %3593 = vmatpush1.bf16.msra.mxu1 %v5084_v22  ;;  %v5142_v11 = vld [vmem:[%s6195_s28 + $0x8f4] ss:$8 sps:$4 sm:$0xff]   ;;  %v5145_v13 = vld [vmem:[%s6195_s28 + $0x8f0] ss:$8 sps:$4 sm:$0xff]   ;;  %v5149_v14 = vld [vmem:[%s6195_s28 + $0x104] ss:$8 sps:$4 sm:$0xff]  }
  0x88   : > { %3921 = vmatpush1.bf16.msra.mxu0 %v5085_v23  ;;  %3594 = vmatprep.subr.bf16.mxu1 %v5086_v24  ;;  %v831_v61 = vrot.slane %v809_v59, %v6248_v49  ;;  %v929_v3 = vrot.slane %v907_v62, %v6248_v49  ;;  %v5153_v15 = vld [vmem:[%s6195_s28 + $0x904] ss:$8 sps:$4 sm:$0xff]   ;;  %v5147_v18 = vld [vmem:[%s6195_s28 + $0x100] ss:$8 sps:$4 sm:$0xff]   ;;  %v5156_v20 = vld [vmem:[%s6195_s28 + $0x114] ss:$8 sps:$4 sm:$0xff]  }
  0x89   : > { %3922 = vmatprep.subr.bf16.mxu0 %v5088_v25  ;;  %v5151_v19 = vld [vmem:[%s6195_s28 + $0x900] ss:$8 sps:$4 sm:$0xff]   ;;  %v5159_v21 = vld [vmem:[%s6195_s28 + $0x914] ss:$8 sps:$4 sm:$0xff]   ;;  %v5154_v24 = vld [vmem:[%s6195_s28 + $0x110] ss:$8 sps:$4 sm:$0xff]  }
  0x8a   : > { %3614 = vmatprep.mubr.bf16.mxu1 %v831_v61  ;;  %3942 = vmatprep.mubr.bf16.mxu0 %v929_v3  ;;  %v841_v22 = vcombine.high %v831_v61, %v831_v61  ;;  %v939_v23 = vcombine.high %v929_v3, %v929_v3  ;;  %v5157_v25 = vld [vmem:[%s6195_s28 + $0x910] ss:$8 sps:$4 sm:$0xff]   ;;  %v5172_v36 = vld [vmem:[%s6195_s28 + $0x140] ss:$8 sps:$4 sm:$0xff]   ;;  %v5180_v38 = vld [vmem:[%s6195_s28 + $0x154] ss:$8 sps:$4 sm:$0xff]  }
  0x8b   : > { %3595 = vmatpush1.bf16.msra.mxu1 %v5090_v26  ;;  %v5162_v26 = vld [vmem:[%s6195_s28 + $0x124] ss:$8 sps:$4 sm:$0xff]   ;;  %v5175_v37 = vld [vmem:[%s6195_s28 + $0x940] ss:$8 sps:$4 sm:$0xff]   ;;  %v5207_v59 = vld [vmem:[%s6195_s28 + $0x994] ss:$8 sps:$4 sm:$0xff]  }
  0x8c   : > { %3923 = vmatpush1.bf16.msra.mxu0 %v5091_v27  ;;  %3596 = vmatprep.subr.bf16.mxu1 %v5092_v28  ;;  %v5165_v27 = vld [vmem:[%s6195_s28 + $0x924] ss:$8 sps:$4 sm:$0xff]   ;;  %v5160_v28 = vld [vmem:[%s6195_s28 + $0x120] ss:$8 sps:$4 sm:$0xff]   ;;  %v5202_v60 = vld [vmem:[%s6195_s28 + $0x190] ss:$8 sps:$4 sm:$0xff]  }
  0x8d   : > { %3924 = vmatprep.subr.bf16.mxu0 %v5094_v29  ;;  %v5163_v29 = vld [vmem:[%s6195_s28 + $0x920] ss:$8 sps:$4 sm:$0xff]   ;;  %v5186_v43 = vld [vmem:[%s6195_s28 + $0x164] ss:$8 sps:$4 sm:$0xff]   ;;  %v5205_v61 = vld [vmem:[%s6195_s28 + $0x990] ss:$8 sps:$4 sm:$0xff]  }
  0x8e   : > { %v5201_v54 = vld [vmem:[%s6195_s28 + $0x984] ss:$8 sps:$4 sm:$0xff]   ;;  %v5219_v3 = vld [vmem:[%s6195_s28 + $0x9b4] ss:$8 sps:$4 sm:$0xff]   ;;  %vm4242_vm0 = vcmask 1041408   ;;  %s4408_s30 = sshll.u32 %s6183_s10, 2 }
  0x8f   : > { %3597 = vmatpush1.bf16.msra.mxu1 %v5096_v30  ;;  %v5168_v30 = vld [vmem:[%s6195_s28 + $0x134] ss:$8 sps:$4 sm:$0xff]   ;;  %v5210_v62 = vld [vmem:[%s6195_s28 + $0x1a4] ss:$8 sps:$4 sm:$0xff]   ;;  %s4930_s7 = sshll.u32 %s6034_s16, 6  ;;  %s261_s9 = scalar_lea.vmem [#allocation8], %s4408_s30 }
  0x90   : > { %3925 = vmatpush1.bf16.msra.mxu0 %v5097_v31  ;;  %3598 = vmatprep.subr.bf16.mxu1 %v5098_v32  ;;  %v5171_v31 = vld [vmem:[%s6195_s28 + $0x934] ss:$8 sps:$4 sm:$0xff]   ;;  %v5166_v32 = vld [vmem:[%s6195_s28 + $0x130] ss:$8 sps:$4 sm:$0xff]   ;;  %s4279_s4 = sshll.u32 %s261_s9, 4  ;;  %s6874_s17 = scalar_lea.hbm %s6921_s3, %s4930_s7  ;;  %s6876_s4 = int_to_ptr.vmem [resolvable:$true] %s4279_s4 }
  0x91   : > { %3926 = vmatprep.subr.bf16.mxu0 %v5100_v33  ;;  %v5169_v33 = vld [vmem:[%s6195_s28 + $0x930] ss:$8 sps:$4 sm:$0xff]   ;;  %s4265_s20 = scalar_lea.sflag [#allocation4], %s6183_s10  ;;  %s5914_s11 = scalar_lea.vmem %s6876_s4, 64 }
  0x92   : > { %p5915_p2 = scmp.ne.s32.totalorder %s6876_s4, %s5914_s11  ;;  %p6935_p7 = scmp.ne.s32.totalorder %s6926_s23, 0 }
  0x93   : > { %3599 = vmatpush1.bf16.msra.mxu1 %v5102_v34  ;;  %v5174_v34 = vld [vmem:[%s6195_s28 + $0x144] ss:$8 sps:$4 sm:$0xff]   ;;  %s5992_s16 = smov [#allocation8]  }
  0x94   : > { %3927 = vmatpush1.bf16.msra.mxu0 %v5103_v35  ;;  %3600 = vmatprep.subr.bf16.mxu1 %v5104_v39  ;;  %v5177_v35 = vld [vmem:[%s6195_s28 + $0x944] ss:$8 sps:$4 sm:$0xff]   ;;  %v5183_v39 = vld [vmem:[%s6195_s28 + $0x954] ss:$8 sps:$4 sm:$0xff]   ;;  %p5916_p9 = pnand %p5915_p2, %p6935_p7  ;;  %s5918_s6 = sshll.u32 %s5992_s16, 4  ;;  %s5919_s6 = int_to_ptr.vmem [resolvable:$false] %s5918_s6 }
  0x95   : > { %3928 = vmatprep.subr.bf16.mxu0 %v5106_v40  ;;  %v5178_v40 = vld [vmem:[%s6195_s28 + $0x150] ss:$8 sps:$4 sm:$0xff]   ;;  %p5921_p12 = scmp.lt.s32.totalorder %s6876_s4, %s5919_s6 }
  0x96   : > { %p5917_p6 = pneg %p5916_p9 }
  0x97   : > { %3601 = vmatpush1.bf16.msra.mxu1 %v5108_v41  ;;  %v5181_v41 = vld [vmem:[%s6195_s28 + $0x950] ss:$8 sps:$4 sm:$0xff]  }
  0x98   : > { %3929 = vmatpush1.bf16.msra.mxu0 %v5109_v44  ;;  %3602 = vmatprep.subr.bf16.mxu1 %v5110_v45  ;;  %v5189_v44 = vld [vmem:[%s6195_s28 + $0x964] ss:$8 sps:$4 sm:$0xff]   ;;  %v5184_v45 = vld [vmem:[%s6195_s28 + $0x160] ss:$8 sps:$4 sm:$0xff]  }
  0x99   : > { %3930 = vmatprep.subr.bf16.mxu0 %v5112_v46  ;;  %v5187_v46 = vld [vmem:[%s6195_s28 + $0x960] ss:$8 sps:$4 sm:$0xff]  }
  0x9b   : > { %3603 = vmatpush1.bf16.msra.mxu1 %v5114_v47  ;;  %v5192_v47 = vld [vmem:[%s6195_s28 + $0x174] ss:$8 sps:$4 sm:$0xff]  }
  0x9c   : > { %3931 = vmatpush1.bf16.msra.mxu0 %v5115_v48  ;;  %3604 = vmatprep.subr.bf16.mxu1 %v5116_v50  ;;  %v5195_v48 = vld [vmem:[%s6195_s28 + $0x974] ss:$8 sps:$4 sm:$0xff]   ;;  %v5190_v50 = vld [vmem:[%s6195_s28 + $0x170] ss:$8 sps:$4 sm:$0xff]  }
  0x9d   : > { %3932 = vmatprep.subr.bf16.mxu0 %v5118_v51  ;;  %v5193_v51 = vld [vmem:[%s6195_s28 + $0x970] ss:$8 sps:$4 sm:$0xff]  }
  0x9f   : > { %3605 = vmatpush1.bf16.msra.mxu1 %v5120_v53  ;;  %v5198_v53 = vld [vmem:[%s6195_s28 + $0x184] ss:$8 sps:$4 sm:$0xff]  }
  0xa0   : > { %3933 = vmatpush1.bf16.msra.mxu0 %v5121_v55  ;;  %3606 = vmatprep.subr.bf16.mxu1 %v5122_v57  ;;  %v5196_v55 = vld [vmem:[%s6195_s28 + $0x180] ss:$8 sps:$4 sm:$0xff]  }
  0xa1   : > { %3934 = vmatprep.subr.bf16.mxu0 %v5124_v58  ;;  %v5199_v57 = vld [vmem:[%s6195_s28 + $0x980] ss:$8 sps:$4 sm:$0xff]   ;;  %v5204_v58 = vld [vmem:[%s6195_s28 + $0x194] ss:$8 sps:$4 sm:$0xff]  }
  0xa3   : > { %3607 = vmatpush1.bf16.msra.mxu1 %v5126_v63  ;;  %v5213_v63 = vld [vmem:[%s6195_s28 + $0x9a4] ss:$8 sps:$4 sm:$0xff]  }
  0xa4   : > { %3935 = vmatpush1.bf16.msra.mxu0 %v5127_v0  ;;  %3608 = vmatprep.subr.bf16.mxu1 %v5128_v1  ;;  %v5208_v0 = vld [vmem:[%s6195_s28 + $0x1a0] ss:$8 sps:$4 sm:$0xff]  }
  0xa5   : > { %3936 = vmatprep.subr.bf16.mxu0 %v5130_v2  ;;  %v5211_v1 = vld [vmem:[%s6195_s28 + $0x9a0] ss:$8 sps:$4 sm:$0xff]   ;;  %v5216_v2 = vld [vmem:[%s6195_s28 + $0x1b4] ss:$8 sps:$4 sm:$0xff]  }
  0xa7   : > { %3609 = vmatpush1.bf16.msra.mxu1 %v5132_v4  ;;  %v5214_v4 = vld [vmem:[%s6195_s28 + $0x1b0] ss:$8 sps:$4 sm:$0xff]  }
  0xa8   : > { %3937 = vmatpush1.bf16.msra.mxu0 %v5133_v5  ;;  %3610 = vmatprep.subr.bf16.mxu1 %v5134_v6  ;;  %v5217_v5 = vld [vmem:[%s6195_s28 + $0x9b0] ss:$8 sps:$4 sm:$0xff]   ;;  %v5222_v6 = vld [vmem:[%s6195_s28 + $0x1c4] ss:$8 sps:$4 sm:$0xff]  }
  0xa9   : > { %3938 = vmatprep.subr.bf16.mxu0 %v5136_v7  ;;  %v5225_v7 = vld [vmem:[%s6195_s28 + $0x9c4] ss:$8 sps:$4 sm:$0xff]  }
  0xab   : > { %3611 = vmatpush1.bf16.msra.mxu1 %v5138_v8  ;;  %v5220_v8 = vld [vmem:[%s6195_s28 + $0x1c0] ss:$8 sps:$4 sm:$0xff]  }
  0xac   : > { %3939 = vmatpush1.bf16.msra.mxu0 %v5139_v9  ;;  %3612 = vmatprep.subr.bf16.mxu1 %v5140_v10  ;;  %v5223_v9 = vld [vmem:[%s6195_s28 + $0x9c0] ss:$8 sps:$4 sm:$0xff]   ;;  %v5228_v10 = vld [vmem:[%s6195_s28 + $0x1d4] ss:$8 sps:$4 sm:$0xff]  }
  0xad   : > { %3940 = vmatprep.subr.bf16.mxu0 %v5142_v11  ;;  %v5231_v11 = vld [vmem:[%s6195_s28 + $0x9d4] ss:$8 sps:$4 sm:$0xff]  }
  0xaf   : > { %3613 = vmatpush1.bf16.msra.mxu1 %v5144_v12  ;;  %v5226_v12 = vld [vmem:[%s6195_s28 + $0x1d0] ss:$8 sps:$4 sm:$0xff]  }
  0xb0   : > { %3941 = vmatpush1.bf16.msra.mxu0 %v5145_v13  ;;  %3623 = vmatprep.subr.bf16.mxu1 %v5149_v14  ;;  %v5229_v13 = vld [vmem:[%s6195_s28 + $0x9d0] ss:$8 sps:$4 sm:$0xff]   ;;  %v5234_v14 = vld [vmem:[%s6195_s28 + $0x1e4] ss:$8 sps:$4 sm:$0xff]  }
  0xb1   : > { %3951 = vmatprep.subr.bf16.mxu0 %v5153_v15  ;;  %v5237_v15 = vld [vmem:[%s6195_s28 + $0x9e4] ss:$8 sps:$4 sm:$0xff]  }
  0xb2   : > { %3615 = vmatmul.mubr.bf16.vlgmr.msra.gmra.mrb[0].mxu1 %v6285_v16 }
  0xb3   : > { %3943 = vmatmul.mubr.bf16.vlgmr.msra.gmra.mrb[0].mxu0 %v6288_v17  ;;  %3624 = vmatpush1.bf16.msra.mxu1 %v5147_v18  ;;  %v794_v18 = vcombine.high %v6253_v52, %v6253_v52  ;;  %v5238_v52 = vld [vmem:[%s6195_s28 + $0x1f0] ss:$8 sps:$4 sm:$0xff]  }
  0xb4   : > { %3952 = vmatpush1.bf16.msra.mxu0 %v5151_v19  ;;  %3625 = vmatprep.subr.bf16.mxu1 %v5156_v20  ;;  %v892_v19 = vcombine.high %v6260_v56, %v6260_v56  ;;  %v5232_v20 = vld [vmem:[%s6195_s28 + $0x1e0] ss:$8 sps:$4 sm:$0xff]   ;;  %v5241_v56 = vld [vmem:[%s6195_s28 + $0x9f0] ss:$8 sps:$4 sm:$0xff]  }
  0xb5   : > { %3953 = vmatprep.subr.bf16.mxu0 %v5159_v21  ;;  %3655 = vmatprep.mubr.bf16.mxu1 %v841_v22  ;;  %v5235_v21 = vld [vmem:[%s6195_s28 + $0x9e0] ss:$8 sps:$4 sm:$0xff]   ;;  %v5240_v22 = vld [vmem:[%s6195_s28 + $0x1f4] ss:$8 sps:$4 sm:$0xff]  }
  0xb6   : > { %3983 = vmatprep.mubr.bf16.mxu0 %v939_v23  ;;  %v5243_v23 = vld [vmem:[%s6195_s28 + $0x9f4] ss:$8 sps:$4 sm:$0xff]  }
  0xb7   : > { %3626 = vmatpush1.bf16.msra.mxu1 %v5154_v24  ;;  %v6357_v24 = vrot.slane %v794_v18, %v6248_v49  ;;  %v5310_v18 = vld [vmem:[%s6195_s28 + $0x2b0] ss:$8 sps:$4 sm:$0xff]  }
  0xb8   : > { %3954 = vmatpush1.bf16.msra.mxu0 %v5157_v25  ;;  %3627 = vmatprep.subr.bf16.mxu1 %v5162_v26  ;;  %v6360_v25 = vrot.slane %v892_v19, %v6248_v49  ;;  %v5246_v26 = vld [vmem:[%s6195_s28 + $0x204] ss:$8 sps:$4 sm:$0xff]   ;;  %v5313_v19 = vld [vmem:[%s6195_s28 + $0xab0] ss:$8 sps:$4 sm:$0xff]  }
  0xb9   : > { %3955 = vmatprep.subr.bf16.mxu0 %v5165_v27  ;;  %v5249_v27 = vld [vmem:[%s6195_s28 + $0xa04] ss:$8 sps:$4 sm:$0xff]  }
  0xbb   : > { %3628 = vmatpush1.bf16.msra.mxu1 %v5160_v28  ;;  %v810_v28 = vcombine.high %v6357_v24, %v6357_v24 }
  0xbc   : > { %3956 = vmatpush1.bf16.msra.mxu0 %v5163_v29  ;;  %3629 = vmatprep.subr.bf16.mxu1 %v5168_v30  ;;  %v908_v29 = vcombine.high %v6360_v25, %v6360_v25  ;;  %v839_v30 = vcombine.high %v6285_v16, %v6285_v16 }
  0xbd   : > { %3957 = vmatprep.subr.bf16.mxu0 %v5171_v31  ;;  %v937_v31 = vcombine.high %v6288_v17, %v6288_v17  ;;  %v5250_v17 = vld [vmem:[%s6195_s28 + $0x210] ss:$8 sps:$4 sm:$0xff]  }
  0xbe   : > { %v6382_v16 = vrot.slane %v908_v29, %v6248_v49  ;;  %v5333_v29 = vld [vmem:[%s6195_s28 + $0xae4] ss:$8 sps:$4 sm:$0xff]  }
  0xbf   : > { %3630 = vmatpush1.bf16.msra.mxu1 %v5166_v32  ;;  %v5244_v32 = vld [vmem:[%s6195_s28 + $0x200] ss:$8 sps:$4 sm:$0xff]  }
  0xc0   : > { %3958 = vmatpush1.bf16.msra.mxu0 %v5169_v33  ;;  %3631 = vmatprep.subr.bf16.mxu1 %v5174_v34  ;;  %v5247_v33 = vld [vmem:[%s6195_s28 + $0xa00] ss:$8 sps:$4 sm:$0xff]   ;;  %v5252_v34 = vld [vmem:[%s6195_s28 + $0x214] ss:$8 sps:$4 sm:$0xff]  }
  0xc1   : > { %3959 = vmatprep.subr.bf16.mxu0 %v5177_v35  ;;  %v5255_v35 = vld [vmem:[%s6195_s28 + $0xa14] ss:$8 sps:$4 sm:$0xff]  }
  0xc3   : > { %3632 = vmatpush1.bf16.msra.mxu1 %v5172_v36  ;;  %v6379_v36 = vrot.slane %v810_v28, %v6248_v49  ;;  %v5330_v28 = vld [vmem:[%s6195_s28 + $0x2e4] ss:$8 sps:$4 sm:$0xff]  }
  0xc4   : > { %3960 = vmatpush1.bf16.msra.mxu0 %v5175_v37  ;;  %3633 = vmatprep.subr.bf16.mxu1 %v5180_v38  ;;  %v5253_v37 = vld [vmem:[%s6195_s28 + $0xa10] ss:$8 sps:$4 sm:$0xff]   ;;  %v5258_v38 = vld [vmem:[%s6195_s28 + $0x224] ss:$8 sps:$4 sm:$0xff]  }
  0xc5   : > { %3961 = vmatprep.subr.bf16.mxu0 %v5183_v39  ;;  %v5261_v39 = vld [vmem:[%s6195_s28 + $0xa24] ss:$8 sps:$4 sm:$0xff]  }
  0xc7   : > { %3634 = vmatpush1.bf16.msra.mxu1 %v5178_v40  ;;  %v5256_v40 = vld [vmem:[%s6195_s28 + $0x220] ss:$8 sps:$4 sm:$0xff]  }
  0xc8   : > { %3962 = vmatpush1.bf16.msra.mxu0 %v5181_v41  ;;  %3635 = vmatprep.subr.bf16.mxu1 %v5186_v43  ;;  %v5259_v41 = vld [vmem:[%s6195_s28 + $0xa20] ss:$8 sps:$4 sm:$0xff]   ;;  %v5264_v43 = vld [vmem:[%s6195_s28 + $0x234] ss:$8 sps:$4 sm:$0xff]  }
  0xc9   : > { %3963 = vmatprep.subr.bf16.mxu0 %v5189_v44  ;;  %v5267_v44 = vld [vmem:[%s6195_s28 + $0xa34] ss:$8 sps:$4 sm:$0xff]  }
  0xcb   : > { %3636 = vmatpush1.bf16.msra.mxu1 %v5184_v45  ;;  %v5262_v45 = vld [vmem:[%s6195_s28 + $0x230] ss:$8 sps:$4 sm:$0xff]  }
  0xcc   : > { %3964 = vmatpush1.bf16.msra.mxu0 %v5187_v46  ;;  %3637 = vmatprep.subr.bf16.mxu1 %v5192_v47  ;;  %v5265_v46 = vld [vmem:[%s6195_s28 + $0xa30] ss:$8 sps:$4 sm:$0xff]   ;;  %v5270_v47 = vld [vmem:[%s6195_s28 + $0x244] ss:$8 sps:$4 sm:$0xff]  }
  0xcd   : > { %3965 = vmatprep.subr.bf16.mxu0 %v5195_v48  ;;  %v5273_v48 = vld [vmem:[%s6195_s28 + $0xa44] ss:$8 sps:$4 sm:$0xff]  }
  0xcf   : > { %3638 = vmatpush1.bf16.msra.mxu1 %v5190_v50  ;;  %v5268_v50 = vld [vmem:[%s6195_s28 + $0x240] ss:$8 sps:$4 sm:$0xff]  }
  0xd0   : > { %3966 = vmatpush1.bf16.msra.mxu0 %v5193_v51  ;;  %3639 = vmatprep.subr.bf16.mxu1 %v5198_v53  ;;  %v5271_v51 = vld [vmem:[%s6195_s28 + $0xa40] ss:$8 sps:$4 sm:$0xff]   ;;  %v5276_v53 = vld [vmem:[%s6195_s28 + $0x254] ss:$8 sps:$4 sm:$0xff]  }
  0xd1   : > { %3967 = vmatprep.subr.bf16.mxu0 %v5201_v54  ;;  %v5279_v54 = vld [vmem:[%s6195_s28 + $0xa54] ss:$8 sps:$4 sm:$0xff]  }
  0xd3   : > { %3640 = vmatpush1.bf16.msra.mxu1 %v5196_v55  ;;  %v5274_v55 = vld [vmem:[%s6195_s28 + $0x250] ss:$8 sps:$4 sm:$0xff]  }
  0xd4   : > { %3968 = vmatpush1.bf16.msra.mxu0 %v5199_v57  ;;  %3641 = vmatprep.subr.bf16.mxu1 %v5204_v58  ;;  %v5277_v57 = vld [vmem:[%s6195_s28 + $0xa50] ss:$8 sps:$4 sm:$0xff]   ;;  %v5282_v58 = vld [vmem:[%s6195_s28 + $0x264] ss:$8 sps:$4 sm:$0xff]  }
  0xd5   : > { %3969 = vmatprep.subr.bf16.mxu0 %v5207_v59  ;;  %v5285_v59 = vld [vmem:[%s6195_s28 + $0xa64] ss:$8 sps:$4 sm:$0xff]  }
  0xd7   : > { %3642 = vmatpush1.bf16.msra.mxu1 %v5202_v60  ;;  %v5280_v60 = vld [vmem:[%s6195_s28 + $0x260] ss:$8 sps:$4 sm:$0xff]  }
  0xd8   : > { %3970 = vmatpush1.bf16.msra.mxu0 %v5205_v61  ;;  %3643 = vmatprep.subr.bf16.mxu1 %v5210_v62  ;;  %v5283_v61 = vld [vmem:[%s6195_s28 + $0xa60] ss:$8 sps:$4 sm:$0xff]   ;;  %v5288_v62 = vld [vmem:[%s6195_s28 + $0x274] ss:$8 sps:$4 sm:$0xff]  }
  0xd9   : > { %3971 = vmatprep.subr.bf16.mxu0 %v5213_v63  ;;  %v5291_v63 = vld [vmem:[%s6195_s28 + $0xa74] ss:$8 sps:$4 sm:$0xff]  }
  0xdb   : > { %3644 = vmatpush1.bf16.msra.mxu1 %v5208_v0  ;;  %v5286_v0 = vld [vmem:[%s6195_s28 + $0x270] ss:$8 sps:$4 sm:$0xff]  }
  0xdc   : > { %3972 = vmatpush1.bf16.msra.mxu0 %v5211_v1  ;;  %3645 = vmatprep.subr.bf16.mxu1 %v5216_v2  ;;  %v5289_v1 = vld [vmem:[%s6195_s28 + $0xa70] ss:$8 sps:$4 sm:$0xff]   ;;  %v5294_v2 = vld [vmem:[%s6195_s28 + $0x284] ss:$8 sps:$4 sm:$0xff]  }
  0xdd   : > { %3973 = vmatprep.subr.bf16.mxu0 %v5219_v3  ;;  %v5297_v3 = vld [vmem:[%s6195_s28 + $0xa84] ss:$8 sps:$4 sm:$0xff]  }
  0xdf   : > { %3646 = vmatpush1.bf16.msra.mxu1 %v5214_v4  ;;  %v5292_v4 = vld [vmem:[%s6195_s28 + $0x280] ss:$8 sps:$4 sm:$0xff]  }
  0xe0   : > { %3974 = vmatpush1.bf16.msra.mxu0 %v5217_v5  ;;  %3647 = vmatprep.subr.bf16.mxu1 %v5222_v6  ;;  %v5295_v5 = vld [vmem:[%s6195_s28 + $0xa80] ss:$8 sps:$4 sm:$0xff]   ;;  %v5300_v6 = vld [vmem:[%s6195_s28 + $0x294] ss:$8 sps:$4 sm:$0xff]  }
  0xe1   : > { %3975 = vmatprep.subr.bf16.mxu0 %v5225_v7  ;;  %v5303_v7 = vld [vmem:[%s6195_s28 + $0xa94] ss:$8 sps:$4 sm:$0xff]  }
  0xe3   : > { %3648 = vmatpush1.bf16.msra.mxu1 %v5220_v8  ;;  %v5298_v8 = vld [vmem:[%s6195_s28 + $0x290] ss:$8 sps:$4 sm:$0xff]  }
  0xe4   : > { %3976 = vmatpush1.bf16.msra.mxu0 %v5223_v9  ;;  %3649 = vmatprep.subr.bf16.mxu1 %v5228_v10  ;;  %v5301_v9 = vld [vmem:[%s6195_s28 + $0xa90] ss:$8 sps:$4 sm:$0xff]   ;;  %v5306_v10 = vld [vmem:[%s6195_s28 + $0x2a4] ss:$8 sps:$4 sm:$0xff]  }
  0xe5   : > { %3977 = vmatprep.subr.bf16.mxu0 %v5231_v11  ;;  %v5309_v11 = vld [vmem:[%s6195_s28 + $0xaa4] ss:$8 sps:$4 sm:$0xff]  }
  0xe7   : > { %3650 = vmatpush1.bf16.msra.mxu1 %v5226_v12  ;;  %v5304_v12 = vld [vmem:[%s6195_s28 + $0x2a0] ss:$8 sps:$4 sm:$0xff]  }
  0xe8   : > { %3978 = vmatpush1.bf16.msra.mxu0 %v5229_v13  ;;  %3651 = vmatprep.subr.bf16.mxu1 %v5234_v14  ;;  %v5307_v13 = vld [vmem:[%s6195_s28 + $0xaa0] ss:$8 sps:$4 sm:$0xff]   ;;  %v5312_v14 = vld [vmem:[%s6195_s28 + $0x2b4] ss:$8 sps:$4 sm:$0xff]  }
  0xe9   : > { %3979 = vmatprep.subr.bf16.mxu0 %v5237_v15  ;;  %v5315_v15 = vld [vmem:[%s6195_s28 + $0xab4] ss:$8 sps:$4 sm:$0xff]  }
  0xeb   : > { %3652 = vmatpush1.bf16.msra.mxu1 %v5232_v20  ;;  %v5318_v20 = vld [vmem:[%s6195_s28 + $0x2c4] ss:$8 sps:$4 sm:$0xff]  }
  0xec   : > { %3980 = vmatpush1.bf16.msra.mxu0 %v5235_v21  ;;  %3653 = vmatprep.subr.bf16.mxu1 %v5240_v22  ;;  %v5321_v21 = vld [vmem:[%s6195_s28 + $0xac4] ss:$8 sps:$4 sm:$0xff]   ;;  %v5316_v22 = vld [vmem:[%s6195_s28 + $0x2c0] ss:$8 sps:$4 sm:$0xff]  }
  0xed   : > { %3981 = vmatprep.subr.bf16.mxu0 %v5243_v23  ;;  %v5319_v23 = vld [vmem:[%s6195_s28 + $0xac0] ss:$8 sps:$4 sm:$0xff]  }
  0xef   : > { %3654 = vmatpush1.bf16.msra.mxu1 %v5238_v52  ;;  %v5324_v52 = vld [vmem:[%s6195_s28 + $0x2d4] ss:$8 sps:$4 sm:$0xff]  }
  0xf0   : > { %3982 = vmatpush1.bf16.msra.mxu0 %v5241_v56  ;;  %3664 = vmatprep.subr.bf16.mxu1 %v5246_v26  ;;  %v5327_v56 = vld [vmem:[%s6195_s28 + $0xad4] ss:$8 sps:$4 sm:$0xff]   ;;  %v5322_v26 = vld [vmem:[%s6195_s28 + $0x2d0] ss:$8 sps:$4 sm:$0xff]  }
  0xf1   : > { %3992 = vmatprep.subr.bf16.mxu0 %v5249_v27  ;;  %v5325_v27 = vld [vmem:[%s6195_s28 + $0xad0] ss:$8 sps:$4 sm:$0xff]  }
  0xf2   : > { %3656 = vmatmul.mubr.bf16.vlgmr.msra.gmra.mrb[0].mxu1 %v839_v30  ;;  %v5328_v30 = vld [vmem:[%s6195_s28 + $0x2e0] ss:$8 sps:$4 sm:$0xff]  }
  0xf3   : > { %3984 = vmatmul.mubr.bf16.vlgmr.msra.gmra.mrb[0].mxu0 %v937_v31  ;;  %3665 = vmatpush1.bf16.msra.mxu1 %v5244_v32  ;;  %v5331_v31 = vld [vmem:[%s6195_s28 + $0xae0] ss:$8 sps:$4 sm:$0xff]   ;;  %v5336_v32 = vld [vmem:[%s6195_s28 + $0x2f4] ss:$8 sps:$4 sm:$0xff]  }
  0xf4   : > { %3993 = vmatpush1.bf16.msra.mxu0 %v5247_v33  ;;  %3666 = vmatprep.subr.bf16.mxu1 %v5252_v34  ;;  %v5339_v33 = vld [vmem:[%s6195_s28 + $0xaf4] ss:$8 sps:$4 sm:$0xff]   ;;  %v5334_v34 = vld [vmem:[%s6195_s28 + $0x2f0] ss:$8 sps:$4 sm:$0xff]  }
  0xf5   : > { %3994 = vmatprep.subr.bf16.mxu0 %v5255_v35  ;;  %3696 = vmatprep.mubr.bf16.mxu1 %v6379_v36  ;;  %v5337_v35 = vld [vmem:[%s6195_s28 + $0xaf0] ss:$8 sps:$4 sm:$0xff]  }
  0xf6   : > { %4024 = vmatprep.mubr.bf16.mxu0 %v6382_v16 }
  0xf7   : > { %3667 = vmatpush1.bf16.msra.mxu1 %v5250_v17  ;;  %v5342_v17 = vld [vmem:[%s6195_s28 + $0x304] ss:$8 sps:$4 sm:$0xff]  }
  0xf8   : > { %3995 = vmatpush1.bf16.msra.mxu0 %v5253_v37  ;;  %3668 = vmatprep.subr.bf16.mxu1 %v5258_v38  ;;  %v5345_v37 = vld [vmem:[%s6195_s28 + $0xb04] ss:$8 sps:$4 sm:$0xff]   ;;  %v6448_v38 = vrot.slane %v6357_v24, %v6248_v49  ;;  %v842_v24 = vcombine.high %v6379_v36, %v6379_v36 }
  0xf9   : > { %3996 = vmatprep.subr.bf16.mxu0 %v5261_v39  ;;  %v6452_v39 = vrot.slane %v6360_v25, %v6248_v49  ;;  %v5346_v25 = vld [vmem:[%s6195_s28 + $0x310] ss:$8 sps:$4 sm:$0xff]   ;;  %v5354_v36 = vld [vmem:[%s6195_s28 + $0x324] ss:$8 sps:$4 sm:$0xff]  }
  0xfb   : > { %3669 = vmatpush1.bf16.msra.mxu1 %v5256_v40  ;;  %v5340_v40 = vld [vmem:[%s6195_s28 + $0x300] ss:$8 sps:$4 sm:$0xff]  }
  0xfc   : > { %3997 = vmatpush1.bf16.msra.mxu0 %v5259_v41  ;;  %3670 = vmatprep.subr.bf16.mxu1 %v5264_v43  ;;  %v5343_v41 = vld [vmem:[%s6195_s28 + $0xb00] ss:$8 sps:$4 sm:$0xff]   ;;  %v5348_v43 = vld [vmem:[%s6195_s28 + $0x314] ss:$8 sps:$4 sm:$0xff]  }
  0xfd   : > { %3998 = vmatprep.subr.bf16.mxu0 %v5267_v44  ;;  %v5351_v44 = vld [vmem:[%s6195_s28 + $0xb14] ss:$8 sps:$4 sm:$0xff]  }
  0xff   : > { %3671 = vmatpush1.bf16.msra.mxu1 %v5262_v45  ;;  %v940_v45 = vcombine.high %v6382_v16, %v6382_v16  ;;  %v5352_v16 = vld [vmem:[%s6195_s28 + $0x320] ss:$8 sps:$4 sm:$0xff]  }
 0x100   : > { %3999 = vmatpush1.bf16.msra.mxu0 %v5265_v46  ;;  %3672 = vmatprep.subr.bf16.mxu1 %v5270_v47  ;;  %v5349_v46 = vld [vmem:[%s6195_s28 + $0xb10] ss:$8 sps:$4 sm:$0xff]   ;;  %v5357_v47 = vld [vmem:[%s6195_s28 + $0xb24] ss:$8 sps:$4 sm:$0xff]  }
 0x101   : > { %4000 = vmatprep.subr.bf16.mxu0 %v5273_v48  ;;  %v5355_v48 = vld [vmem:[%s6195_s28 + $0xb20] ss:$8 sps:$4 sm:$0xff]  }
 0x103   : > { %3673 = vmatpush1.bf16.msra.mxu1 %v5268_v50  ;;  %v5360_v50 = vld [vmem:[%s6195_s28 + $0x334] ss:$8 sps:$4 sm:$0xff]  }
 0x104   : > { %4001 = vmatpush1.bf16.msra.mxu0 %v5271_v51  ;;  %3674 = vmatprep.subr.bf16.mxu1 %v5276_v53  ;;  %v5363_v51 = vld [vmem:[%s6195_s28 + $0xb34] ss:$8 sps:$4 sm:$0xff]   ;;  %v5358_v53 = vld [vmem:[%s6195_s28 + $0x330] ss:$8 sps:$4 sm:$0xff]  }
 0x105   : > { %4002 = vmatprep.subr.bf16.mxu0 %v5279_v54  ;;  %v5361_v54 = vld [vmem:[%s6195_s28 + $0xb30] ss:$8 sps:$4 sm:$0xff]  }
 0x107   : > { %3675 = vmatpush1.bf16.msra.mxu1 %v5274_v55  ;;  %v5366_v55 = vld [vmem:[%s6195_s28 + $0x344] ss:$8 sps:$4 sm:$0xff]  }
 0x108   : > { %4003 = vmatpush1.bf16.msra.mxu0 %v5277_v57  ;;  %3676 = vmatprep.subr.bf16.mxu1 %v5282_v58  ;;  %v5369_v57 = vld [vmem:[%s6195_s28 + $0xb44] ss:$8 sps:$4 sm:$0xff]   ;;  %v5364_v58 = vld [vmem:[%s6195_s28 + $0x340] ss:$8 sps:$4 sm:$0xff]  }
 0x109   : > { %4004 = vmatprep.subr.bf16.mxu0 %v5285_v59  ;;  %v5367_v59 = vld [vmem:[%s6195_s28 + $0xb40] ss:$8 sps:$4 sm:$0xff]  }
 0x10b   : > { %3677 = vmatpush1.bf16.msra.mxu1 %v5280_v60  ;;  %v5372_v60 = vld [vmem:[%s6195_s28 + $0x354] ss:$8 sps:$4 sm:$0xff]  }
 0x10c   : > { %4005 = vmatpush1.bf16.msra.mxu0 %v5283_v61  ;;  %3678 = vmatprep.subr.bf16.mxu1 %v5288_v62  ;;  %v5375_v61 = vld [vmem:[%s6195_s28 + $0xb54] ss:$8 sps:$4 sm:$0xff]   ;;  %v5370_v62 = vld [vmem:[%s6195_s28 + $0x350] ss:$8 sps:$4 sm:$0xff]  }
 0x10d   : > { %4006 = vmatprep.subr.bf16.mxu0 %v5291_v63  ;;  %v5373_v63 = vld [vmem:[%s6195_s28 + $0xb50] ss:$8 sps:$4 sm:$0xff]  }
 0x10f   : > { %3679 = vmatpush1.bf16.msra.mxu1 %v5286_v0  ;;  %v5378_v0 = vld [vmem:[%s6195_s28 + $0x364] ss:$8 sps:$4 sm:$0xff]  }
 0x110   : > { %4007 = vmatpush1.bf16.msra.mxu0 %v5289_v1  ;;  %3680 = vmatprep.subr.bf16.mxu1 %v5294_v2  ;;  %v5381_v1 = vld [vmem:[%s6195_s28 + $0xb64] ss:$8 sps:$4 sm:$0xff]   ;;  %v5376_v2 = vld [vmem:[%s6195_s28 + $0x360] ss:$8 sps:$4 sm:$0xff]  }
 0x111   : > { %4008 = vmatprep.subr.bf16.mxu0 %v5297_v3  ;;  %v5379_v3 = vld [vmem:[%s6195_s28 + $0xb60] ss:$8 sps:$4 sm:$0xff]  }
 0x113   : > { %3681 = vmatpush1.bf16.msra.mxu1 %v5292_v4  ;;  %v5384_v4 = vld [vmem:[%s6195_s28 + $0x374] ss:$8 sps:$4 sm:$0xff]  }
 0x114   : > { %4009 = vmatpush1.bf16.msra.mxu0 %v5295_v5  ;;  %3682 = vmatprep.subr.bf16.mxu1 %v5300_v6  ;;  %v5387_v5 = vld [vmem:[%s6195_s28 + $0xb74] ss:$8 sps:$4 sm:$0xff]   ;;  %v5382_v6 = vld [vmem:[%s6195_s28 + $0x370] ss:$8 sps:$4 sm:$0xff]  }
 0x115   : > { %4010 = vmatprep.subr.bf16.mxu0 %v5303_v7  ;;  %v5385_v7 = vld [vmem:[%s6195_s28 + $0xb70] ss:$8 sps:$4 sm:$0xff]  }
 0x117   : > { %3683 = vmatpush1.bf16.msra.mxu1 %v5298_v8  ;;  %v5390_v8 = vld [vmem:[%s6195_s28 + $0x384] ss:$8 sps:$4 sm:$0xff]  }
 0x118   : > { %4011 = vmatpush1.bf16.msra.mxu0 %v5301_v9  ;;  %3684 = vmatprep.subr.bf16.mxu1 %v5306_v10  ;;  %v5393_v9 = vld [vmem:[%s6195_s28 + $0xb84] ss:$8 sps:$4 sm:$0xff]   ;;  %v5388_v10 = vld [vmem:[%s6195_s28 + $0x380] ss:$8 sps:$4 sm:$0xff]  }
 0x119   : > { %4012 = vmatprep.subr.bf16.mxu0 %v5309_v11  ;;  %v5391_v11 = vld [vmem:[%s6195_s28 + $0xb80] ss:$8 sps:$4 sm:$0xff]  }
 0x11b   : > { %3685 = vmatpush1.bf16.msra.mxu1 %v5304_v12  ;;  %v5396_v12 = vld [vmem:[%s6195_s28 + $0x394] ss:$8 sps:$4 sm:$0xff]  }
 0x11c   : > { %4013 = vmatpush1.bf16.msra.mxu0 %v5307_v13  ;;  %3686 = vmatprep.subr.bf16.mxu1 %v5312_v14  ;;  %v5399_v13 = vld [vmem:[%s6195_s28 + $0xb94] ss:$8 sps:$4 sm:$0xff]   ;;  %v5394_v14 = vld [vmem:[%s6195_s28 + $0x390] ss:$8 sps:$4 sm:$0xff]  }
 0x11d   : > { %4014 = vmatprep.subr.bf16.mxu0 %v5315_v15  ;;  %v5397_v15 = vld [vmem:[%s6195_s28 + $0xb90] ss:$8 sps:$4 sm:$0xff]  }
 0x11f   : > { %3687 = vmatpush1.bf16.msra.mxu1 %v5310_v18  ;;  %v5402_v18 = vld [vmem:[%s6195_s28 + $0x3a4] ss:$8 sps:$4 sm:$0xff]  }
 0x120   : > { %4015 = vmatpush1.bf16.msra.mxu0 %v5313_v19  ;;  %3688 = vmatprep.subr.bf16.mxu1 %v5318_v20  ;;  %v5405_v19 = vld [vmem:[%s6195_s28 + $0xba4] ss:$8 sps:$4 sm:$0xff]   ;;  %v5400_v20 = vld [vmem:[%s6195_s28 + $0x3a0] ss:$8 sps:$4 sm:$0xff]  }
 0x121   : > { %4016 = vmatprep.subr.bf16.mxu0 %v5321_v21  ;;  %v5403_v21 = vld [vmem:[%s6195_s28 + $0xba0] ss:$8 sps:$4 sm:$0xff]  }
 0x123   : > { %3689 = vmatpush1.bf16.msra.mxu1 %v5316_v22  ;;  %v5408_v22 = vld [vmem:[%s6195_s28 + $0x3b4] ss:$8 sps:$4 sm:$0xff]  }
 0x124   : > { %4017 = vmatpush1.bf16.msra.mxu0 %v5319_v23  ;;  %3690 = vmatprep.subr.bf16.mxu1 %v5324_v52  ;;  %v5411_v23 = vld [vmem:[%s6195_s28 + $0xbb4] ss:$8 sps:$4 sm:$0xff]   ;;  %v5406_v52 = vld [vmem:[%s6195_s28 + $0x3b0] ss:$8 sps:$4 sm:$0xff]  }
 0x125   : > { %4018 = vmatprep.subr.bf16.mxu0 %v5327_v56  ;;  %v5409_v56 = vld [vmem:[%s6195_s28 + $0xbb0] ss:$8 sps:$4 sm:$0xff]  }
 0x127   : > { %3691 = vmatpush1.bf16.msra.mxu1 %v5322_v26  ;;  %v5414_v26 = vld [vmem:[%s6195_s28 + $0x3c4] ss:$8 sps:$4 sm:$0xff]  }
 0x128   : > { %4019 = vmatpush1.bf16.msra.mxu0 %v5325_v27  ;;  %3692 = vmatprep.subr.bf16.mxu1 %v5330_v28  ;;  %v5417_v27 = vld [vmem:[%s6195_s28 + $0xbc4] ss:$8 sps:$4 sm:$0xff]   ;;  %v5412_v28 = vld [vmem:[%s6195_s28 + $0x3c0] ss:$8 sps:$4 sm:$0xff]  }
 0x129   : > { %4020 = vmatprep.subr.bf16.mxu0 %v5333_v29  ;;  %v5415_v29 = vld [vmem:[%s6195_s28 + $0xbc0] ss:$8 sps:$4 sm:$0xff]  }
 0x12b   : > { %3693 = vmatpush1.bf16.msra.mxu1 %v5328_v30  ;;  %v5420_v30 = vld [vmem:[%s6195_s28 + $0x3d4] ss:$8 sps:$4 sm:$0xff]  }
 0x12c   : > { %4021 = vmatpush1.bf16.msra.mxu0 %v5331_v31  ;;  %3694 = vmatprep.subr.bf16.mxu1 %v5336_v32  ;;  %v5423_v31 = vld [vmem:[%s6195_s28 + $0xbd4] ss:$8 sps:$4 sm:$0xff]   ;;  %v5418_v32 = vld [vmem:[%s6195_s28 + $0x3d0] ss:$8 sps:$4 sm:$0xff]  }
 0x12d   : > { %4022 = vmatprep.subr.bf16.mxu0 %v5339_v33  ;;  %v5421_v33 = vld [vmem:[%s6195_s28 + $0xbd0] ss:$8 sps:$4 sm:$0xff]  }
 0x12f   : > { %3695 = vmatpush1.bf16.msra.mxu1 %v5334_v34  ;;  %v5426_v34 = vld [vmem:[%s6195_s28 + $0x3e4] ss:$8 sps:$4 sm:$0xff]  }
 0x130   : > { %4023 = vmatpush1.bf16.msra.mxu0 %v5337_v35  ;;  %3705 = vmatprep.subr.bf16.mxu1 %v5342_v17  ;;  %v5429_v35 = vld [vmem:[%s6195_s28 + $0xbe4] ss:$8 sps:$4 sm:$0xff]   ;;  %v5424_v17 = vld [vmem:[%s6195_s28 + $0x3e0] ss:$8 sps:$4 sm:$0xff]  }
 0x131   : > { %4033 = vmatprep.subr.bf16.mxu0 %v5345_v37  ;;  %v5427_v37 = vld [vmem:[%s6195_s28 + $0xbe0] ss:$8 sps:$4 sm:$0xff]  }
 0x132   : > { %3697 = vmatmul.mubr.bf16.vlgmr.msra.gmra.mrb[0].mxu1 %v6448_v38 }
 0x133   : > { %4025 = vmatmul.mubr.bf16.vlgmr.msra.gmra.mrb[0].mxu0 %v6452_v39  ;;  %3706 = vmatpush1.bf16.msra.mxu1 %v5340_v40  ;;  %v6519_v40 = vld [vmem:[%s6187_s27 + $0x8] sm:$0xff] }
 0x134   : > { %4034 = vmatpush1.bf16.msra.mxu0 %v5343_v41  ;;  %3707 = vmatprep.subr.bf16.mxu1 %v5348_v43  ;;  %v6522_v41 = vld [vmem:[%s6187_s27 + $0x18] sm:$0xff]  ;;  %s5920_s27 = scalar_lea.vmem %s5919_s6, 128 }
 0x135   : > { %4035 = vmatprep.subr.bf16.mxu0 %v5351_v44  ;;  %3737 = vmatprep.mubr.bf16.mxu1 %v842_v24  ;;  %v5432_v43 = vld [vmem:[%s6195_s28 + $0x3f4] ss:$8 sps:$4 sm:$0xff]   ;;  %v6528_v24 = vrot.slane %v6519_v40, %v6248_v49  ;;  %p5922_p0 = scmp.lt.s32.totalorder %s5920_s27, %s5914_s11 }
 0x136   : > { %4065 = vmatprep.mubr.bf16.mxu0 %v940_v45  ;;  %v5435_v44 = vld [vmem:[%s6195_s28 + $0xbf4] ss:$8 sps:$4 sm:$0xff]   ;;  %v6532_v45 = vrot.slane %v6522_v41, %v6248_v49 }
 0x137   : > { %3708 = vmatpush1.bf16.msra.mxu1 %v5346_v25  ;;  %v5430_v25 = vld [vmem:[%s6195_s28 + $0x3f0] ss:$8 sps:$4 sm:$0xff]   ;;  %p5923_p8 = por %p5922_p0, %p5921_p12 }
 0x138   : > { %4036 = vmatpush1.bf16.msra.mxu0 %v5349_v46  ;;  %3709 = vmatprep.subr.bf16.mxu1 %v5354_v36  ;;  %v5433_v46 = vld [vmem:[%s6195_s28 + $0xbf0] ss:$8 sps:$4 sm:$0xff]   ;;  %v5438_v36 = vld [vmem:[%s6195_s28 + $0x404] ss:$8 sps:$4 sm:$0xff]  }
 0x139   : > { %4037 = vmatprep.subr.bf16.mxu0 %v5357_v47  ;;  %v5441_v47 = vld [vmem:[%s6195_s28 + $0xc04] ss:$8 sps:$4 sm:$0xff]   ;;  %p5924_p10 = pnand %p5923_p8, %p5917_p6 }
 0x13b   : > { %3710 = vmatpush1.bf16.msra.mxu1 %v5352_v16  ;;  %v858_v16 = vcombine.high %v6528_v24, %v6528_v24 }
 0x13c   : > { %4038 = vmatpush1.bf16.msra.mxu0 %v5355_v48  ;;  %3711 = vmatprep.subr.bf16.mxu1 %v5360_v50  ;;  %v956_v48 = vcombine.high %v6532_v45, %v6532_v45  ;;  %v5436_v50 = vld [vmem:[%s6195_s28 + $0x400] ss:$8 sps:$4 sm:$0xff]  }
 0x13d   : > { %4039 = vmatprep.subr.bf16.mxu0 %v5363_v51  ;;  %v5439_v51 = vld [vmem:[%s6195_s28 + $0xc00] ss:$8 sps:$4 sm:$0xff]  }
 0x13f   : > { %3712 = vmatpush1.bf16.msra.mxu1 %v5358_v53  ;;  %v840_v53 = vcombine.high %v6448_v38, %v6448_v38  ;;  %v5442_v38 = vld [vmem:[%s6195_s28 + $0x410] ss:$8 sps:$4 sm:$0xff]  }
 0x140   : > { %4040 = vmatpush1.bf16.msra.mxu0 %v5361_v54  ;;  %3713 = vmatprep.subr.bf16.mxu1 %v5366_v55  ;;  %v938_v54 = vcombine.high %v6452_v39, %v6452_v39  ;;  %v5444_v55 = vld [vmem:[%s6195_s28 + $0x414] ss:$8 sps:$4 sm:$0xff]   ;;  %v5445_v39 = vld [vmem:[%s6195_s28 + $0xc10] ss:$8 sps:$4 sm:$0xff]  }
 0x141   : > { %4041 = vmatprep.subr.bf16.mxu0 %v5369_v57  ;;  %v5447_v57 = vld [vmem:[%s6195_s28 + $0xc14] ss:$8 sps:$4 sm:$0xff]  }
 0x143   : > { %3714 = vmatpush1.bf16.msra.mxu1 %v5364_v58  ;;  %v6551_v58 = vrot.slane %v858_v16, %v6248_v49  ;;  %v5514_v16 = vld [vmem:[%s6195_s28 + $0x4d0] ss:$8 sps:$4 sm:$0xff]  }
 0x144   : > { %4042 = vmatpush1.bf16.msra.mxu0 %v5367_v59  ;;  %3715 = vmatprep.subr.bf16.mxu1 %v5372_v60  ;;  %v6554_v59 = vrot.slane %v956_v48, %v6248_v49  ;;  %v5450_v60 = vld [vmem:[%s6195_s28 + $0x424] ss:$8 sps:$4 sm:$0xff]   ;;  %v5517_v48 = vld [vmem:[%s6195_s28 + $0xcd0] ss:$8 sps:$4 sm:$0xff]  }
 0x145   : > { %4043 = vmatprep.subr.bf16.mxu0 %v5375_v61  ;;  %v5453_v61 = vld [vmem:[%s6195_s28 + $0xc24] ss:$8 sps:$4 sm:$0xff]  }
 0x147   : > { %3716 = vmatpush1.bf16.msra.mxu1 %v5370_v62  ;;  %v5448_v62 = vld [vmem:[%s6195_s28 + $0x420] ss:$8 sps:$4 sm:$0xff]  }
 0x148   : > { %4044 = vmatpush1.bf16.msra.mxu0 %v5373_v63  ;;  %3717 = vmatprep.subr.bf16.mxu1 %v5378_v0  ;;  %v5451_v63 = vld [vmem:[%s6195_s28 + $0xc20] ss:$8 sps:$4 sm:$0xff]   ;;  %v5456_v0 = vld [vmem:[%s6195_s28 + $0x434] ss:$8 sps:$4 sm:$0xff]  }
 0x149   : > { %4045 = vmatprep.subr.bf16.mxu0 %v5381_v1  ;;  %v5459_v1 = vld [vmem:[%s6195_s28 + $0xc34] ss:$8 sps:$4 sm:$0xff]  }
 0x14b   : > { %3718 = vmatpush1.bf16.msra.mxu1 %v5376_v2  ;;  %v5454_v2 = vld [vmem:[%s6195_s28 + $0x430] ss:$8 sps:$4 sm:$0xff]  }
 0x14c   : > { %4046 = vmatpush1.bf16.msra.mxu0 %v5379_v3  ;;  %3719 = vmatprep.subr.bf16.mxu1 %v5384_v4  ;;  %v5457_v3 = vld [vmem:[%s6195_s28 + $0xc30] ss:$8 sps:$4 sm:$0xff]   ;;  %v5462_v4 = vld [vmem:[%s6195_s28 + $0x444] ss:$8 sps:$4 sm:$0xff]  }
 0x14d   : > { %4047 = vmatprep.subr.bf16.mxu0 %v5387_v5  ;;  %v5465_v5 = vld [vmem:[%s6195_s28 + $0xc44] ss:$8 sps:$4 sm:$0xff]  }
 0x14f   : > { %3720 = vmatpush1.bf16.msra.mxu1 %v5382_v6  ;;  %v5460_v6 = vld [vmem:[%s6195_s28 + $0x440] ss:$8 sps:$4 sm:$0xff]  }
 0x150   : > { %4048 = vmatpush1.bf16.msra.mxu0 %v5385_v7  ;;  %3721 = vmatprep.subr.bf16.mxu1 %v5390_v8  ;;  %v5463_v7 = vld [vmem:[%s6195_s28 + $0xc40] ss:$8 sps:$4 sm:$0xff]   ;;  %v5468_v8 = vld [vmem:[%s6195_s28 + $0x454] ss:$8 sps:$4 sm:$0xff]  }
 0x151   : > { %4049 = vmatprep.subr.bf16.mxu0 %v5393_v9  ;;  %v5471_v9 = vld [vmem:[%s6195_s28 + $0xc54] ss:$8 sps:$4 sm:$0xff]  }
 0x153   : > { %3722 = vmatpush1.bf16.msra.mxu1 %v5388_v10  ;;  %v5466_v10 = vld [vmem:[%s6195_s28 + $0x450] ss:$8 sps:$4 sm:$0xff]  }
 0x154   : > { %4050 = vmatpush1.bf16.msra.mxu0 %v5391_v11  ;;  %3723 = vmatprep.subr.bf16.mxu1 %v5396_v12  ;;  %v5469_v11 = vld [vmem:[%s6195_s28 + $0xc50] ss:$8 sps:$4 sm:$0xff]   ;;  %v5474_v12 = vld [vmem:[%s6195_s28 + $0x464] ss:$8 sps:$4 sm:$0xff]  }
 0x155   : > { %4051 = vmatprep.subr.bf16.mxu0 %v5399_v13  ;;  %v5477_v13 = vld [vmem:[%s6195_s28 + $0xc64] ss:$8 sps:$4 sm:$0xff]  }
 0x157   : > { %3724 = vmatpush1.bf16.msra.mxu1 %v5394_v14  ;;  %v5472_v14 = vld [vmem:[%s6195_s28 + $0x460] ss:$8 sps:$4 sm:$0xff]  }
 0x158   : > { %4052 = vmatpush1.bf16.msra.mxu0 %v5397_v15  ;;  %3725 = vmatprep.subr.bf16.mxu1 %v5402_v18  ;;  %v5475_v15 = vld [vmem:[%s6195_s28 + $0xc60] ss:$8 sps:$4 sm:$0xff]   ;;  %v5480_v18 = vld [vmem:[%s6195_s28 + $0x474] ss:$8 sps:$4 sm:$0xff]  }
 0x159   : > { %4053 = vmatprep.subr.bf16.mxu0 %v5405_v19  ;;  %v5483_v19 = vld [vmem:[%s6195_s28 + $0xc74] ss:$8 sps:$4 sm:$0xff]  }
 0x15b   : > { %3726 = vmatpush1.bf16.msra.mxu1 %v5400_v20  ;;  %v5478_v20 = vld [vmem:[%s6195_s28 + $0x470] ss:$8 sps:$4 sm:$0xff]  }
 0x15c   : > { %4054 = vmatpush1.bf16.msra.mxu0 %v5403_v21  ;;  %3727 = vmatprep.subr.bf16.mxu1 %v5408_v22  ;;  %v5481_v21 = vld [vmem:[%s6195_s28 + $0xc70] ss:$8 sps:$4 sm:$0xff]   ;;  %v5486_v22 = vld [vmem:[%s6195_s28 + $0x484] ss:$8 sps:$4 sm:$0xff]  }
 0x15d   : > { %4055 = vmatprep.subr.bf16.mxu0 %v5411_v23  ;;  %v5489_v23 = vld [vmem:[%s6195_s28 + $0xc84] ss:$8 sps:$4 sm:$0xff]  }
 0x15f   : > { %3728 = vmatpush1.bf16.msra.mxu1 %v5406_v52  ;;  %v5484_v52 = vld [vmem:[%s6195_s28 + $0x480] ss:$8 sps:$4 sm:$0xff]  }
 0x160   : > { %4056 = vmatpush1.bf16.msra.mxu0 %v5409_v56  ;;  %3729 = vmatprep.subr.bf16.mxu1 %v5414_v26  ;;  %v5487_v56 = vld [vmem:[%s6195_s28 + $0xc80] ss:$8 sps:$4 sm:$0xff]   ;;  %v5492_v26 = vld [vmem:[%s6195_s28 + $0x494] ss:$8 sps:$4 sm:$0xff]  }
 0x161   : > { %4057 = vmatprep.subr.bf16.mxu0 %v5417_v27  ;;  %v5495_v27 = vld [vmem:[%s6195_s28 + $0xc94] ss:$8 sps:$4 sm:$0xff]  }
 0x163   : > { %3730 = vmatpush1.bf16.msra.mxu1 %v5412_v28  ;;  %v5490_v28 = vld [vmem:[%s6195_s28 + $0x490] ss:$8 sps:$4 sm:$0xff]  }
 0x164   : > { %4058 = vmatpush1.bf16.msra.mxu0 %v5415_v29  ;;  %3731 = vmatprep.subr.bf16.mxu1 %v5420_v30  ;;  %v5493_v29 = vld [vmem:[%s6195_s28 + $0xc90] ss:$8 sps:$4 sm:$0xff]   ;;  %v5498_v30 = vld [vmem:[%s6195_s28 + $0x4a4] ss:$8 sps:$4 sm:$0xff]  }
 0x165   : > { %4059 = vmatprep.subr.bf16.mxu0 %v5423_v31  ;;  %v5501_v31 = vld [vmem:[%s6195_s28 + $0xca4] ss:$8 sps:$4 sm:$0xff]  }
 0x167   : > { %3732 = vmatpush1.bf16.msra.mxu1 %v5418_v32  ;;  %v5496_v32 = vld [vmem:[%s6195_s28 + $0x4a0] ss:$8 sps:$4 sm:$0xff]  }
 0x168   : > { %4060 = vmatpush1.bf16.msra.mxu0 %v5421_v33  ;;  %3733 = vmatprep.subr.bf16.mxu1 %v5426_v34  ;;  %v5499_v33 = vld [vmem:[%s6195_s28 + $0xca0] ss:$8 sps:$4 sm:$0xff]   ;;  %v5504_v34 = vld [vmem:[%s6195_s28 + $0x4b4] ss:$8 sps:$4 sm:$0xff]  }
 0x169   : > { %4061 = vmatprep.subr.bf16.mxu0 %v5429_v35  ;;  %v5507_v35 = vld [vmem:[%s6195_s28 + $0xcb4] ss:$8 sps:$4 sm:$0xff]  }
 0x16b   : > { %3734 = vmatpush1.bf16.msra.mxu1 %v5424_v17  ;;  %v5502_v17 = vld [vmem:[%s6195_s28 + $0x4b0] ss:$8 sps:$4 sm:$0xff]  }
 0x16c   : > { %4062 = vmatpush1.bf16.msra.mxu0 %v5427_v37  ;;  %3735 = vmatprep.subr.bf16.mxu1 %v5432_v43  ;;  %v5505_v37 = vld [vmem:[%s6195_s28 + $0xcb0] ss:$8 sps:$4 sm:$0xff]   ;;  %v5510_v43 = vld [vmem:[%s6195_s28 + $0x4c4] ss:$8 sps:$4 sm:$0xff]  }
 0x16d   : > { %4063 = vmatprep.subr.bf16.mxu0 %v5435_v44  ;;  %v5513_v44 = vld [vmem:[%s6195_s28 + $0xcc4] ss:$8 sps:$4 sm:$0xff]  }
 0x16f   : > { %3736 = vmatpush1.bf16.msra.mxu1 %v5430_v25  ;;  %v5508_v25 = vld [vmem:[%s6195_s28 + $0x4c0] ss:$8 sps:$4 sm:$0xff]  }
 0x170   : > { %4064 = vmatpush1.bf16.msra.mxu0 %v5433_v46  ;;  %3746 = vmatprep.subr.bf16.mxu1 %v5438_v36  ;;  %v5511_v46 = vld [vmem:[%s6195_s28 + $0xcc0] ss:$8 sps:$4 sm:$0xff]   ;;  %v5516_v36 = vld [vmem:[%s6195_s28 + $0x4d4] ss:$8 sps:$4 sm:$0xff]  }
 0x171   : > { %4074 = vmatprep.subr.bf16.mxu0 %v5441_v47  ;;  %v5519_v47 = vld [vmem:[%s6195_s28 + $0xcd4] ss:$8 sps:$4 sm:$0xff]  }
 0x172   : > { %3738 = vmatmul.mubr.bf16.vlgmr.msra.gmra.mrb[0].mxu1 %v840_v53  ;;  %v5520_v53 = vld [vmem:[%s6195_s28 + $0x4e0] ss:$8 sps:$4 sm:$0xff]  }
 0x173   : > { %4066 = vmatmul.mubr.bf16.vlgmr.msra.gmra.mrb[0].mxu0 %v938_v54  ;;  %3747 = vmatpush1.bf16.msra.mxu1 %v5436_v50  ;;  %v5522_v50 = vld [vmem:[%s6195_s28 + $0x4e4] ss:$8 sps:$4 sm:$0xff]   ;;  %v5523_v54 = vld [vmem:[%s6195_s28 + $0xce0] ss:$8 sps:$4 sm:$0xff]  }
 0x174   : > { %4075 = vmatpush1.bf16.msra.mxu0 %v5439_v51  ;;  %3748 = vmatprep.subr.bf16.mxu1 %v5444_v55  ;;  %v5525_v51 = vld [vmem:[%s6195_s28 + $0xce4] ss:$8 sps:$4 sm:$0xff]   ;;  %v5528_v55 = vld [vmem:[%s6195_s28 + $0x4f4] ss:$8 sps:$4 sm:$0xff]  }
 0x175   : > { %4076 = vmatprep.subr.bf16.mxu0 %v5447_v57  ;;  %3778 = vmatprep.mubr.bf16.mxu1 %v6551_v58  ;;  %v5531_v57 = vld [vmem:[%s6195_s28 + $0xcf4] ss:$8 sps:$4 sm:$0xff]  }
 0x176   : > { %4106 = vmatprep.mubr.bf16.mxu0 %v6554_v59 }
 0x177   : > { %3749 = vmatpush1.bf16.msra.mxu1 %v5442_v38  ;;  %v5526_v38 = vld [vmem:[%s6195_s28 + $0x4f0] ss:$8 sps:$4 sm:$0xff]  }
 0x178   : > { %4077 = vmatpush1.bf16.msra.mxu0 %v5445_v39  ;;  %3750 = vmatprep.subr.bf16.mxu1 %v5450_v60  ;;  %v5529_v39 = vld [vmem:[%s6195_s28 + $0xcf0] ss:$8 sps:$4 sm:$0xff]   ;;  %v5534_v60 = vld [vmem:[%s6195_s28 + $0x504] ss:$8 sps:$4 sm:$0xff]  }
 0x179   : > { %4078 = vmatprep.subr.bf16.mxu0 %v5453_v61  ;;  %v5537_v61 = vld [vmem:[%s6195_s28 + $0xd04] ss:$8 sps:$4 sm:$0xff]  }
 0x17b   : > { %3751 = vmatpush1.bf16.msra.mxu1 %v5448_v62  ;;  %v6620_v62 = vrot.slane %v6528_v24, %v6248_v49  ;;  %v890_v24 = vcombine.high %v6551_v58, %v6551_v58  ;;  %v5546_v58 = vld [vmem:[%s6195_s28 + $0x524] ss:$8 sps:$4 sm:$0xff]  }
 0x17c   : > { %4079 = vmatpush1.bf16.msra.mxu0 %v5451_v63  ;;  %3752 = vmatprep.subr.bf16.mxu1 %v5456_v0  ;;  %v6624_v63 = vrot.slane %v6532_v45, %v6248_v49  ;;  %v5532_v0 = vld [vmem:[%s6195_s28 + $0x500] ss:$8 sps:$4 sm:$0xff]   ;;  %v5538_v45 = vld [vmem:[%s6195_s28 + $0x510] ss:$8 sps:$4 sm:$0xff]  }
 0x17d   : > { %4080 = vmatprep.subr.bf16.mxu0 %v5459_v1  ;;  %v5535_v1 = vld [vmem:[%s6195_s28 + $0xd00] ss:$8 sps:$4 sm:$0xff]  }
 0x17f   : > { %3753 = vmatpush1.bf16.msra.mxu1 %v5454_v2  ;;  %v5540_v2 = vld [vmem:[%s6195_s28 + $0x514] ss:$8 sps:$4 sm:$0xff]  }
 0x180   : > { %4081 = vmatpush1.bf16.msra.mxu0 %v5457_v3  ;;  %3754 = vmatprep.subr.bf16.mxu1 %v5462_v4  ;;  %v5543_v3 = vld [vmem:[%s6195_s28 + $0xd14] ss:$8 sps:$4 sm:$0xff]   ;;  %v988_v4 = vcombine.high %v6554_v59, %v6554_v59  ;;  %v5544_v59 = vld [vmem:[%s6195_s28 + $0x520] ss:$8 sps:$4 sm:$0xff]  }
 0x181   : > { %4082 = vmatprep.subr.bf16.mxu0 %v5465_v5  ;;  %v5541_v5 = vld [vmem:[%s6195_s28 + $0xd10] ss:$8 sps:$4 sm:$0xff]  }
 0x183   : > { %3755 = vmatpush1.bf16.msra.mxu1 %v5460_v6  ;;  %v5549_v6 = vld [vmem:[%s6195_s28 + $0xd24] ss:$8 sps:$4 sm:$0xff]  }
 0x184   : > { %4083 = vmatpush1.bf16.msra.mxu0 %v5463_v7  ;;  %3756 = vmatprep.subr.bf16.mxu1 %v5468_v8  ;;  %v5547_v7 = vld [vmem:[%s6195_s28 + $0xd20] ss:$8 sps:$4 sm:$0xff]   ;;  %v5552_v8 = vld [vmem:[%s6195_s28 + $0x534] ss:$8 sps:$4 sm:$0xff]  }
 0x185   : > { %4084 = vmatprep.subr.bf16.mxu0 %v5471_v9  ;;  %v5555_v9 = vld [vmem:[%s6195_s28 + $0xd34] ss:$8 sps:$4 sm:$0xff]  }
 0x187   : > { %3757 = vmatpush1.bf16.msra.mxu1 %v5466_v10  ;;  %v5550_v10 = vld [vmem:[%s6195_s28 + $0x530] ss:$8 sps:$4 sm:$0xff]  }
 0x188   : > { %4085 = vmatpush1.bf16.msra.mxu0 %v5469_v11  ;;  %3758 = vmatprep.subr.bf16.mxu1 %v5474_v12  ;;  %v5553_v11 = vld [vmem:[%s6195_s28 + $0xd30] ss:$8 sps:$4 sm:$0xff]   ;;  %v5558_v12 = vld [vmem:[%s6195_s28 + $0x544] ss:$8 sps:$4 sm:$0xff]  }
 0x189   : > { %4086 = vmatprep.subr.bf16.mxu0 %v5477_v13  ;;  %v5561_v13 = vld [vmem:[%s6195_s28 + $0xd44] ss:$8 sps:$4 sm:$0xff]  }
 0x18b   : > { %3759 = vmatpush1.bf16.msra.mxu1 %v5472_v14  ;;  %v5556_v14 = vld [vmem:[%s6195_s28 + $0x540] ss:$8 sps:$4 sm:$0xff]  }
 0x18c   : > { %4087 = vmatpush1.bf16.msra.mxu0 %v5475_v15  ;;  %3760 = vmatprep.subr.bf16.mxu1 %v5480_v18  ;;  %v5559_v15 = vld [vmem:[%s6195_s28 + $0xd40] ss:$8 sps:$4 sm:$0xff]   ;;  %v5564_v18 = vld [vmem:[%s6195_s28 + $0x554] ss:$8 sps:$4 sm:$0xff]  }
 0x18d   : > { %4088 = vmatprep.subr.bf16.mxu0 %v5483_v19  ;;  %v5567_v19 = vld [vmem:[%s6195_s28 + $0xd54] ss:$8 sps:$4 sm:$0xff]  }
 0x18f   : > { %3761 = vmatpush1.bf16.msra.mxu1 %v5478_v20  ;;  %v5562_v20 = vld [vmem:[%s6195_s28 + $0x550] ss:$8 sps:$4 sm:$0xff]  }
 0x190   : > { %4089 = vmatpush1.bf16.msra.mxu0 %v5481_v21  ;;  %3762 = vmatprep.subr.bf16.mxu1 %v5486_v22  ;;  %v5565_v21 = vld [vmem:[%s6195_s28 + $0xd50] ss:$8 sps:$4 sm:$0xff]   ;;  %v5570_v22 = vld [vmem:[%s6195_s28 + $0x564] ss:$8 sps:$4 sm:$0xff]  }
 0x191   : > { %4090 = vmatprep.subr.bf16.mxu0 %v5489_v23  ;;  %v5573_v23 = vld [vmem:[%s6195_s28 + $0xd64] ss:$8 sps:$4 sm:$0xff]  }
 0x193   : > { %3763 = vmatpush1.bf16.msra.mxu1 %v5484_v52  ;;  %v5568_v52 = vld [vmem:[%s6195_s28 + $0x560] ss:$8 sps:$4 sm:$0xff]  }
 0x194   : > { %4091 = vmatpush1.bf16.msra.mxu0 %v5487_v56  ;;  %3764 = vmatprep.subr.bf16.mxu1 %v5492_v26  ;;  %v5571_v56 = vld [vmem:[%s6195_s28 + $0xd60] ss:$8 sps:$4 sm:$0xff]   ;;  %v5576_v26 = vld [vmem:[%s6195_s28 + $0x574] ss:$8 sps:$4 sm:$0xff]  }
 0x195   : > { %4092 = vmatprep.subr.bf16.mxu0 %v5495_v27  ;;  %v5579_v27 = vld [vmem:[%s6195_s28 + $0xd74] ss:$8 sps:$4 sm:$0xff]  }
 0x197   : > { %3765 = vmatpush1.bf16.msra.mxu1 %v5490_v28  ;;  %v5574_v28 = vld [vmem:[%s6195_s28 + $0x570] ss:$8 sps:$4 sm:$0xff]  }
 0x198   : > { %4093 = vmatpush1.bf16.msra.mxu0 %v5493_v29  ;;  %3766 = vmatprep.subr.bf16.mxu1 %v5498_v30  ;;  %v5577_v29 = vld [vmem:[%s6195_s28 + $0xd70] ss:$8 sps:$4 sm:$0xff]   ;;  %v5582_v30 = vld [vmem:[%s6195_s28 + $0x584] ss:$8 sps:$4 sm:$0xff]  }
 0x199   : > { %4094 = vmatprep.subr.bf16.mxu0 %v5501_v31  ;;  %v5585_v31 = vld [vmem:[%s6195_s28 + $0xd84] ss:$8 sps:$4 sm:$0xff]  }
 0x19b   : > { %3767 = vmatpush1.bf16.msra.mxu1 %v5496_v32  ;;  %v5580_v32 = vld [vmem:[%s6195_s28 + $0x580] ss:$8 sps:$4 sm:$0xff]  }
 0x19c   : > { %4095 = vmatpush1.bf16.msra.mxu0 %v5499_v33  ;;  %3768 = vmatprep.subr.bf16.mxu1 %v5504_v34  ;;  %v5583_v33 = vld [vmem:[%s6195_s28 + $0xd80] ss:$8 sps:$4 sm:$0xff]   ;;  %v5588_v34 = vld [vmem:[%s6195_s28 + $0x594] ss:$8 sps:$4 sm:$0xff]  }
 0x19d   : > { %4096 = vmatprep.subr.bf16.mxu0 %v5507_v35  ;;  %v5591_v35 = vld [vmem:[%s6195_s28 + $0xd94] ss:$8 sps:$4 sm:$0xff]  }
 0x19f   : > { %3769 = vmatpush1.bf16.msra.mxu1 %v5502_v17  ;;  %v5586_v17 = vld [vmem:[%s6195_s28 + $0x590] ss:$8 sps:$4 sm:$0xff]  }
 0x1a0   : > { %4097 = vmatpush1.bf16.msra.mxu0 %v5505_v37  ;;  %3770 = vmatprep.subr.bf16.mxu1 %v5510_v43  ;;  %v5589_v37 = vld [vmem:[%s6195_s28 + $0xd90] ss:$8 sps:$4 sm:$0xff]   ;;  %v5594_v43 = vld [vmem:[%s6195_s28 + $0x5a4] ss:$8 sps:$4 sm:$0xff]  }
 0x1a1   : > { %4098 = vmatprep.subr.bf16.mxu0 %v5513_v44  ;;  %v5597_v44 = vld [vmem:[%s6195_s28 + $0xda4] ss:$8 sps:$4 sm:$0xff]  }
 0x1a3   : > { %3771 = vmatpush1.bf16.msra.mxu1 %v5508_v25  ;;  %v5592_v25 = vld [vmem:[%s6195_s28 + $0x5a0] ss:$8 sps:$4 sm:$0xff]  }
 0x1a4   : > { %4099 = vmatpush1.bf16.msra.mxu0 %v5511_v46  ;;  %3772 = vmatprep.subr.bf16.mxu1 %v5516_v36  ;;  %v5595_v46 = vld [vmem:[%s6195_s28 + $0xda0] ss:$8 sps:$4 sm:$0xff]   ;;  %v5600_v36 = vld [vmem:[%s6195_s28 + $0x5b4] ss:$8 sps:$4 sm:$0xff]  }
 0x1a5   : > { %4100 = vmatprep.subr.bf16.mxu0 %v5519_v47  ;;  %v5603_v47 = vld [vmem:[%s6195_s28 + $0xdb4] ss:$8 sps:$4 sm:$0xff]  }
 0x1a7   : > { %3773 = vmatpush1.bf16.msra.mxu1 %v5514_v16  ;;  %v5598_v16 = vld [vmem:[%s6195_s28 + $0x5b0] ss:$8 sps:$4 sm:$0xff]  }
 0x1a8   : > { %4101 = vmatpush1.bf16.msra.mxu0 %v5517_v48  ;;  %3774 = vmatprep.subr.bf16.mxu1 %v5522_v50  ;;  %v5601_v48 = vld [vmem:[%s6195_s28 + $0xdb0] ss:$8 sps:$4 sm:$0xff]   ;;  %v5606_v50 = vld [vmem:[%s6195_s28 + $0x5c4] ss:$8 sps:$4 sm:$0xff]  }
 0x1a9   : > { %4102 = vmatprep.subr.bf16.mxu0 %v5525_v51  ;;  %v5609_v51 = vld [vmem:[%s6195_s28 + $0xdc4] ss:$8 sps:$4 sm:$0xff]  }
 0x1ab   : > { %3775 = vmatpush1.bf16.msra.mxu1 %v5520_v53  ;;  %v5604_v53 = vld [vmem:[%s6195_s28 + $0x5c0] ss:$8 sps:$4 sm:$0xff]  }
 0x1ac   : > { %4103 = vmatpush1.bf16.msra.mxu0 %v5523_v54  ;;  %3776 = vmatprep.subr.bf16.mxu1 %v5528_v55  ;;  %v5607_v54 = vld [vmem:[%s6195_s28 + $0xdc0] ss:$8 sps:$4 sm:$0xff]   ;;  %v5612_v55 = vld [vmem:[%s6195_s28 + $0x5d4] ss:$8 sps:$4 sm:$0xff]  }
 0x1ad   : > { %4104 = vmatprep.subr.bf16.mxu0 %v5531_v57  ;;  %v5615_v57 = vld [vmem:[%s6195_s28 + $0xdd4] ss:$8 sps:$4 sm:$0xff]  }
 0x1af   : > { %3777 = vmatpush1.bf16.msra.mxu1 %v5526_v38  ;;  %v5610_v38 = vld [vmem:[%s6195_s28 + $0x5d0] ss:$8 sps:$4 sm:$0xff]  }
 0x1b0   : > { %4105 = vmatpush1.bf16.msra.mxu0 %v5529_v39  ;;  %3787 = vmatprep.subr.bf16.mxu1 %v5534_v60  ;;  %v5613_v39 = vld [vmem:[%s6195_s28 + $0xdd0] ss:$8 sps:$4 sm:$0xff]   ;;  %v5618_v60 = vld [vmem:[%s6195_s28 + $0x5e4] ss:$8 sps:$4 sm:$0xff]  }
 0x1b1   : > { %4115 = vmatprep.subr.bf16.mxu0 %v5537_v61  ;;  %v5621_v61 = vld [vmem:[%s6195_s28 + $0xde4] ss:$8 sps:$4 sm:$0xff]  }
 0x1b2   : > { %3779 = vmatmul.mubr.bf16.vlgmr.msra.gmra.mrb[0].mxu1 %v6620_v62 }
 0x1b3   : > { %4107 = vmatmul.mubr.bf16.vlgmr.msra.gmra.mrb[0].mxu0 %v6624_v63  ;;  %3788 = vmatpush1.bf16.msra.mxu1 %v5532_v0  ;;  %v843_v0 = vcombine.high %v6519_v40, %v6519_v40  ;;  %v5622_v40 = vld [vmem:[%s6195_s28 + $0x5f0] ss:$8 sps:$4 sm:$0xff]  }
 0x1b4   : > { %4116 = vmatpush1.bf16.msra.mxu0 %v5535_v1  ;;  %3789 = vmatprep.subr.bf16.mxu1 %v5540_v2  ;;  %v941_v1 = vcombine.high %v6522_v41, %v6522_v41  ;;  %v5616_v2 = vld [vmem:[%s6195_s28 + $0x5e0] ss:$8 sps:$4 sm:$0xff]   ;;  %v5625_v41 = vld [vmem:[%s6195_s28 + $0xdf0] ss:$8 sps:$4 sm:$0xff]  }
 0x1b5   : > { %4117 = vmatprep.subr.bf16.mxu0 %v5543_v3  ;;  %3819 = vmatprep.mubr.bf16.mxu1 %v890_v24  ;;  %v5619_v3 = vld [vmem:[%s6195_s28 + $0xde0] ss:$8 sps:$4 sm:$0xff]   ;;  %v5624_v24 = vld [vmem:[%s6195_s28 + $0x5f4] ss:$8 sps:$4 sm:$0xff]  }
 0x1b6   : > { %4147 = vmatprep.mubr.bf16.mxu0 %v988_v4  ;;  %v5627_v4 = vld [vmem:[%s6195_s28 + $0xdf4] ss:$8 sps:$4 sm:$0xff]  }
 0x1b7   : > { %3790 = vmatpush1.bf16.msra.mxu1 %v5538_v45  ;;  %v6697_v45 = vrot.slane %v843_v0, %v6248_v49  ;;  %v5694_v0 = vld [vmem:[%s6195_s28 + $0x6b0] ss:$8 sps:$4 sm:$0xff]  }
 0x1b8   : > { %4118 = vmatpush1.bf16.msra.mxu0 %v5541_v5  ;;  %3791 = vmatprep.subr.bf16.mxu1 %v5546_v58  ;;  %v6700_v5 = vrot.slane %v941_v1, %v6248_v49  ;;  %v5630_v58 = vld [vmem:[%s6195_s28 + $0x604] ss:$8 sps:$4 sm:$0xff]   ;;  %v5697_v1 = vld [vmem:[%s6195_s28 + $0xeb0] ss:$8 sps:$4 sm:$0xff]  }
 0x1b9   : > { %4119 = vmatprep.subr.bf16.mxu0 %v5549_v6  ;;  %v5633_v6 = vld [vmem:[%s6195_s28 + $0xe04] ss:$8 sps:$4 sm:$0xff]  }
 0x1bb   : > { %3792 = vmatpush1.bf16.msra.mxu1 %v5544_v59  ;;  %v859_v59 = vcombine.high %v6697_v45, %v6697_v45 }
 0x1bc   : > { %4120 = vmatpush1.bf16.msra.mxu0 %v5547_v7  ;;  %3793 = vmatprep.subr.bf16.mxu1 %v5552_v8  ;;  %v957_v7 = vcombine.high %v6700_v5, %v6700_v5  ;;  %v888_v8 = vcombine.high %v6620_v62, %v6620_v62 }
 0x1bd   : > { %4121 = vmatprep.subr.bf16.mxu0 %v5555_v9  ;;  %v986_v9 = vcombine.high %v6624_v63, %v6624_v63  ;;  %v5634_v63 = vld [vmem:[%s6195_s28 + $0x610] ss:$8 sps:$4 sm:$0xff]  }
 0x1be   : > { %v6722_v62 = vrot.slane %v957_v7, %v6248_v49  ;;  %v5717_v7 = vld [vmem:[%s6195_s28 + $0xee4] ss:$8 sps:$4 sm:$0xff]  }
 0x1bf   : > { %3794 = vmatpush1.bf16.msra.mxu1 %v5550_v10  ;;  %v5628_v10 = vld [vmem:[%s6195_s28 + $0x600] ss:$8 sps:$4 sm:$0xff]  }
 0x1c0   : > { %4122 = vmatpush1.bf16.msra.mxu0 %v5553_v11  ;;  %3795 = vmatprep.subr.bf16.mxu1 %v5558_v12  ;;  %v5631_v11 = vld [vmem:[%s6195_s28 + $0xe00] ss:$8 sps:$4 sm:$0xff]   ;;  %v5636_v12 = vld [vmem:[%s6195_s28 + $0x614] ss:$8 sps:$4 sm:$0xff]  }
 0x1c1   : > { %4123 = vmatprep.subr.bf16.mxu0 %v5561_v13  ;;  %v5639_v13 = vld [vmem:[%s6195_s28 + $0xe14] ss:$8 sps:$4 sm:$0xff]  }
 0x1c3   : > { %3796 = vmatpush1.bf16.msra.mxu1 %v5556_v14  ;;  %v6719_v14 = vrot.slane %v859_v59, %v6248_v49  ;;  %v5714_v59 = vld [vmem:[%s6195_s28 + $0x6e4] ss:$8 sps:$4 sm:$0xff]  }
 0x1c4   : > { %4124 = vmatpush1.bf16.msra.mxu0 %v5559_v15  ;;  %3797 = vmatprep.subr.bf16.mxu1 %v5564_v18  ;;  %v5637_v15 = vld [vmem:[%s6195_s28 + $0xe10] ss:$8 sps:$4 sm:$0xff]   ;;  %v5642_v18 = vld [vmem:[%s6195_s28 + $0x624] ss:$8 sps:$4 sm:$0xff]  }
 0x1c5   : > { %4125 = vmatprep.subr.bf16.mxu0 %v5567_v19  ;;  %v5645_v19 = vld [vmem:[%s6195_s28 + $0xe24] ss:$8 sps:$4 sm:$0xff]  }
 0x1c7   : > { %3798 = vmatpush1.bf16.msra.mxu1 %v5562_v20  ;;  %v5640_v20 = vld [vmem:[%s6195_s28 + $0x620] ss:$8 sps:$4 sm:$0xff]  }
 0x1c8   : > { %4126 = vmatpush1.bf16.msra.mxu0 %v5565_v21  ;;  %3799 = vmatprep.subr.bf16.mxu1 %v5570_v22  ;;  %v5643_v21 = vld [vmem:[%s6195_s28 + $0xe20] ss:$8 sps:$4 sm:$0xff]   ;;  %v5648_v22 = vld [vmem:[%s6195_s28 + $0x634] ss:$8 sps:$4 sm:$0xff]  }
 0x1c9   : > { %4127 = vmatprep.subr.bf16.mxu0 %v5573_v23  ;;  %v5651_v23 = vld [vmem:[%s6195_s28 + $0xe34] ss:$8 sps:$4 sm:$0xff]  }
 0x1cb   : > { %3800 = vmatpush1.bf16.msra.mxu1 %v5568_v52  ;;  %v5646_v52 = vld [vmem:[%s6195_s28 + $0x630] ss:$8 sps:$4 sm:$0xff]  }
 0x1cc   : > { %4128 = vmatpush1.bf16.msra.mxu0 %v5571_v56  ;;  %3801 = vmatprep.subr.bf16.mxu1 %v5576_v26  ;;  %v5649_v56 = vld [vmem:[%s6195_s28 + $0xe30] ss:$8 sps:$4 sm:$0xff]   ;;  %v5654_v26 = vld [vmem:[%s6195_s28 + $0x644] ss:$8 sps:$4 sm:$0xff]  }
 0x1cd   : > { %4129 = vmatprep.subr.bf16.mxu0 %v5579_v27  ;;  %v5657_v27 = vld [vmem:[%s6195_s28 + $0xe44] ss:$8 sps:$4 sm:$0xff]  }
 0x1cf   : > { %3802 = vmatpush1.bf16.msra.mxu1 %v5574_v28  ;;  %v5652_v28 = vld [vmem:[%s6195_s28 + $0x640] ss:$8 sps:$4 sm:$0xff]  }
 0x1d0   : > { %4130 = vmatpush1.bf16.msra.mxu0 %v5577_v29  ;;  %3803 = vmatprep.subr.bf16.mxu1 %v5582_v30  ;;  %v5655_v29 = vld [vmem:[%s6195_s28 + $0xe40] ss:$8 sps:$4 sm:$0xff]   ;;  %v5660_v30 = vld [vmem:[%s6195_s28 + $0x654] ss:$8 sps:$4 sm:$0xff]  }
 0x1d1   : > { %4131 = vmatprep.subr.bf16.mxu0 %v5585_v31  ;;  %v5663_v31 = vld [vmem:[%s6195_s28 + $0xe54] ss:$8 sps:$4 sm:$0xff]  }
 0x1d3   : > { %3804 = vmatpush1.bf16.msra.mxu1 %v5580_v32  ;;  %v5658_v32 = vld [vmem:[%s6195_s28 + $0x650] ss:$8 sps:$4 sm:$0xff]  }
 0x1d4   : > { %4132 = vmatpush1.bf16.msra.mxu0 %v5583_v33  ;;  %3805 = vmatprep.subr.bf16.mxu1 %v5588_v34  ;;  %v5661_v33 = vld [vmem:[%s6195_s28 + $0xe50] ss:$8 sps:$4 sm:$0xff]   ;;  %v5666_v34 = vld [vmem:[%s6195_s28 + $0x664] ss:$8 sps:$4 sm:$0xff]  }
 0x1d5   : > { %4133 = vmatprep.subr.bf16.mxu0 %v5591_v35  ;;  %v5669_v35 = vld [vmem:[%s6195_s28 + $0xe64] ss:$8 sps:$4 sm:$0xff]  }
 0x1d7   : > { %3806 = vmatpush1.bf16.msra.mxu1 %v5586_v17  ;;  %v5664_v17 = vld [vmem:[%s6195_s28 + $0x660] ss:$8 sps:$4 sm:$0xff]  }
 0x1d8   : > { %4134 = vmatpush1.bf16.msra.mxu0 %v5589_v37  ;;  %3807 = vmatprep.subr.bf16.mxu1 %v5594_v43  ;;  %v5667_v37 = vld [vmem:[%s6195_s28 + $0xe60] ss:$8 sps:$4 sm:$0xff]   ;;  %v5672_v43 = vld [vmem:[%s6195_s28 + $0x674] ss:$8 sps:$4 sm:$0xff]  }
 0x1d9   : > { %4135 = vmatprep.subr.bf16.mxu0 %v5597_v44  ;;  %v5675_v44 = vld [vmem:[%s6195_s28 + $0xe74] ss:$8 sps:$4 sm:$0xff]  }
 0x1db   : > { %3808 = vmatpush1.bf16.msra.mxu1 %v5592_v25  ;;  %v5670_v25 = vld [vmem:[%s6195_s28 + $0x670] ss:$8 sps:$4 sm:$0xff]  }
 0x1dc   : > { %4136 = vmatpush1.bf16.msra.mxu0 %v5595_v46  ;;  %3809 = vmatprep.subr.bf16.mxu1 %v5600_v36  ;;  %v5673_v46 = vld [vmem:[%s6195_s28 + $0xe70] ss:$8 sps:$4 sm:$0xff]   ;;  %v5678_v36 = vld [vmem:[%s6195_s28 + $0x684] ss:$8 sps:$4 sm:$0xff]  }
 0x1dd   : > { %4137 = vmatprep.subr.bf16.mxu0 %v5603_v47  ;;  %v5681_v47 = vld [vmem:[%s6195_s28 + $0xe84] ss:$8 sps:$4 sm:$0xff]  }
 0x1df   : > { %3810 = vmatpush1.bf16.msra.mxu1 %v5598_v16  ;;  %v5676_v16 = vld [vmem:[%s6195_s28 + $0x680] ss:$8 sps:$4 sm:$0xff]  }
 0x1e0   : > { %4138 = vmatpush1.bf16.msra.mxu0 %v5601_v48  ;;  %3811 = vmatprep.subr.bf16.mxu1 %v5606_v50  ;;  %v5679_v48 = vld [vmem:[%s6195_s28 + $0xe80] ss:$8 sps:$4 sm:$0xff]   ;;  %v5684_v50 = vld [vmem:[%s6195_s28 + $0x694] ss:$8 sps:$4 sm:$0xff]  }
 0x1e1   : > { %4139 = vmatprep.subr.bf16.mxu0 %v5609_v51  ;;  %v5687_v51 = vld [vmem:[%s6195_s28 + $0xe94] ss:$8 sps:$4 sm:$0xff]  }
 0x1e3   : > { %3812 = vmatpush1.bf16.msra.mxu1 %v5604_v53  ;;  %v5682_v53 = vld [vmem:[%s6195_s28 + $0x690] ss:$8 sps:$4 sm:$0xff]  }
 0x1e4   : > { %4140 = vmatpush1.bf16.msra.mxu0 %v5607_v54  ;;  %3813 = vmatprep.subr.bf16.mxu1 %v5612_v55  ;;  %v5685_v54 = vld [vmem:[%s6195_s28 + $0xe90] ss:$8 sps:$4 sm:$0xff]   ;;  %v5690_v55 = vld [vmem:[%s6195_s28 + $0x6a4] ss:$8 sps:$4 sm:$0xff]  }
 0x1e5   : > { %4141 = vmatprep.subr.bf16.mxu0 %v5615_v57  ;;  %v5693_v57 = vld [vmem:[%s6195_s28 + $0xea4] ss:$8 sps:$4 sm:$0xff]  }
 0x1e7   : > { %3814 = vmatpush1.bf16.msra.mxu1 %v5610_v38  ;;  %v5688_v38 = vld [vmem:[%s6195_s28 + $0x6a0] ss:$8 sps:$4 sm:$0xff]  }
 0x1e8   : > { %4142 = vmatpush1.bf16.msra.mxu0 %v5613_v39  ;;  %3815 = vmatprep.subr.bf16.mxu1 %v5618_v60  ;;  %v5691_v39 = vld [vmem:[%s6195_s28 + $0xea0] ss:$8 sps:$4 sm:$0xff]   ;;  %v5696_v60 = vld [vmem:[%s6195_s28 + $0x6b4] ss:$8 sps:$4 sm:$0xff]  }
 0x1e9   : > { %4143 = vmatprep.subr.bf16.mxu0 %v5621_v61  ;;  %v5699_v61 = vld [vmem:[%s6195_s28 + $0xeb4] ss:$8 sps:$4 sm:$0xff]  }
 0x1eb   : > { %3816 = vmatpush1.bf16.msra.mxu1 %v5616_v2  ;;  %v5702_v2 = vld [vmem:[%s6195_s28 + $0x6c4] ss:$8 sps:$4 sm:$0xff]  }
 0x1ec   : > { %4144 = vmatpush1.bf16.msra.mxu0 %v5619_v3  ;;  %3817 = vmatprep.subr.bf16.mxu1 %v5624_v24  ;;  %v5705_v3 = vld [vmem:[%s6195_s28 + $0xec4] ss:$8 sps:$4 sm:$0xff]   ;;  %v5700_v24 = vld [vmem:[%s6195_s28 + $0x6c0] ss:$8 sps:$4 sm:$0xff]  }
 0x1ed   : > { %4145 = vmatprep.subr.bf16.mxu0 %v5627_v4  ;;  %v5703_v4 = vld [vmem:[%s6195_s28 + $0xec0] ss:$8 sps:$4 sm:$0xff]  }
 0x1ef   : > { %3818 = vmatpush1.bf16.msra.mxu1 %v5622_v40  ;;  %v5708_v40 = vld [vmem:[%s6195_s28 + $0x6d4] ss:$8 sps:$4 sm:$0xff]  }
 0x1f0   : > { %4146 = vmatpush1.bf16.msra.mxu0 %v5625_v41  ;;  %3828 = vmatprep.subr.bf16.mxu1 %v5630_v58  ;;  %v5711_v41 = vld [vmem:[%s6195_s28 + $0xed4] ss:$8 sps:$4 sm:$0xff]   ;;  %v5706_v58 = vld [vmem:[%s6195_s28 + $0x6d0] ss:$8 sps:$4 sm:$0xff]  }
 0x1f1   : > { %4156 = vmatprep.subr.bf16.mxu0 %v5633_v6  ;;  %v5709_v6 = vld [vmem:[%s6195_s28 + $0xed0] ss:$8 sps:$4 sm:$0xff]  }
 0x1f2   : > { %3820 = vmatmul.mubr.bf16.vlgmr.msra.gmra.mrb[0].mxu1 %v888_v8  ;;  %v5712_v8 = vld [vmem:[%s6195_s28 + $0x6e0] ss:$8 sps:$4 sm:$0xff]  }
 0x1f3   : > { %4148 = vmatmul.mubr.bf16.vlgmr.msra.gmra.mrb[0].mxu0 %v986_v9  ;;  %3829 = vmatpush1.bf16.msra.mxu1 %v5628_v10  ;;  %v5715_v9 = vld [vmem:[%s6195_s28 + $0xee0] ss:$8 sps:$4 sm:$0xff]   ;;  %v5720_v10 = vld [vmem:[%s6195_s28 + $0x6f4] ss:$8 sps:$4 sm:$0xff]  }
 0x1f4   : > { %4157 = vmatpush1.bf16.msra.mxu0 %v5631_v11  ;;  %3830 = vmatprep.subr.bf16.mxu1 %v5636_v12  ;;  %v5723_v11 = vld [vmem:[%s6195_s28 + $0xef4] ss:$8 sps:$4 sm:$0xff]   ;;  %v5718_v12 = vld [vmem:[%s6195_s28 + $0x6f0] ss:$8 sps:$4 sm:$0xff]  }
 0x1f5   : > { %4158 = vmatprep.subr.bf16.mxu0 %v5639_v13  ;;  %3860 = vmatprep.mubr.bf16.mxu1 %v6719_v14  ;;  %v5721_v13 = vld [vmem:[%s6195_s28 + $0xef0] ss:$8 sps:$4 sm:$0xff]  }
 0x1f6   : > { %4188 = vmatprep.mubr.bf16.mxu0 %v6722_v62 }
 0x1f7   : > { %3831 = vmatpush1.bf16.msra.mxu1 %v5634_v63  ;;  %v5727_v63 = vld [vmem:[%s6195_s28 + $0x704] ss:$8 sps:$4 sm:$0xff]  }
 0x1f8   : > { %4159 = vmatpush1.bf16.msra.mxu0 %v5637_v15  ;;  %3832 = vmatprep.subr.bf16.mxu1 %v5642_v18  ;;  %v5731_v15 = vld [vmem:[%s6195_s28 + $0xf04] ss:$8 sps:$4 sm:$0xff]   ;;  %v6788_v18 = vrot.slane %v6697_v45, %v6248_v49  ;;  %v891_v45 = vcombine.high %v6719_v14, %v6719_v14 }
 0x1f9   : > { %4160 = vmatprep.subr.bf16.mxu0 %v5645_v19  ;;  %v6792_v19 = vrot.slane %v6700_v5, %v6248_v49  ;;  %v5732_v49 = vld [vmem:[%s6195_s28 + $0x710] ss:$8 sps:$4 sm:$0xff]   ;;  %v5740_v14 = vld [vmem:[%s6195_s28 + $0x724] ss:$8 sps:$4 sm:$0xff]  }
 0x1fa   : > { %v5735_v5 = vld [vmem:[%s6195_s28 + $0xf10] ss:$8 sps:$4 sm:$0xff]  }
 0x1fb   : > { %3833 = vmatpush1.bf16.msra.mxu1 %v5640_v20  ;;  %v5725_v20 = vld [vmem:[%s6195_s28 + $0x700] ss:$8 sps:$4 sm:$0xff]  }
 0x1fc   : > { %4161 = vmatpush1.bf16.msra.mxu0 %v5643_v21  ;;  %3834 = vmatprep.subr.bf16.mxu1 %v5648_v22  ;;  %v5729_v21 = vld [vmem:[%s6195_s28 + $0xf00] ss:$8 sps:$4 sm:$0xff]   ;;  %v5734_v22 = vld [vmem:[%s6195_s28 + $0x714] ss:$8 sps:$4 sm:$0xff]  }
 0x1fd   : > { %4162 = vmatprep.subr.bf16.mxu0 %v5651_v23  ;;  %v5737_v23 = vld [vmem:[%s6195_s28 + $0xf14] ss:$8 sps:$4 sm:$0xff]  }
 0x1ff   : > { %3835 = vmatpush1.bf16.msra.mxu1 %v5646_v52  ;;  %v989_v52 = vcombine.high %v6722_v62, %v6722_v62  ;;  %v5738_v62 = vld [vmem:[%s6195_s28 + $0x720] ss:$8 sps:$4 sm:$0xff]  }
 0x200   : > { %4163 = vmatpush1.bf16.msra.mxu0 %v5649_v56  ;;  %3836 = vmatprep.subr.bf16.mxu1 %v5654_v26  ;;  %v5743_v56 = vld [vmem:[%s6195_s28 + $0xf24] ss:$8 sps:$4 sm:$0xff]   ;;  %v5741_v26 = vld [vmem:[%s6195_s28 + $0xf20] ss:$8 sps:$4 sm:$0xff]  }
 0x201   : > { %4164 = vmatprep.subr.bf16.mxu0 %v5657_v27  ;;  %v5746_v27 = vld [vmem:[%s6195_s28 + $0x734] ss:$8 sps:$4 sm:$0xff]  }
 0x203   : > { %3837 = vmatpush1.bf16.msra.mxu1 %v5652_v28  ;;  %v5749_v28 = vld [vmem:[%s6195_s28 + $0xf34] ss:$8 sps:$4 sm:$0xff]  }
 0x204   : > { %4165 = vmatpush1.bf16.msra.mxu0 %v5655_v29  ;;  %3838 = vmatprep.subr.bf16.mxu1 %v5660_v30  ;;  %v5744_v29 = vld [vmem:[%s6195_s28 + $0x730] ss:$8 sps:$4 sm:$0xff]  }
 0x205   : > { %4166 = vmatprep.subr.bf16.mxu0 %v5663_v31  ;;  %v5747_v30 = vld [vmem:[%s6195_s28 + $0xf30] ss:$8 sps:$4 sm:$0xff]   ;;  %v5752_v31 = vld [vmem:[%s6195_s28 + $0x744] ss:$8 sps:$4 sm:$0xff]  }
 0x207   : > { %3839 = vmatpush1.bf16.msra.mxu1 %v5658_v32  ;;  %v5755_v32 = vld [vmem:[%s6195_s28 + $0xf44] ss:$8 sps:$4 sm:$0xff]  }
 0x208   : > { %4167 = vmatpush1.bf16.msra.mxu0 %v5661_v33  ;;  %3840 = vmatprep.subr.bf16.mxu1 %v5666_v34  ;;  %v5750_v33 = vld [vmem:[%s6195_s28 + $0x740] ss:$8 sps:$4 sm:$0xff]  }
 0x209   : > { %4168 = vmatprep.subr.bf16.mxu0 %v5669_v35  ;;  %v5753_v34 = vld [vmem:[%s6195_s28 + $0xf40] ss:$8 sps:$4 sm:$0xff]   ;;  %v5758_v35 = vld [vmem:[%s6195_s28 + $0x754] ss:$8 sps:$4 sm:$0xff]  }
 0x20b   : > { %3841 = vmatpush1.bf16.msra.mxu1 %v5664_v17  ;;  %v5761_v17 = vld [vmem:[%s6195_s28 + $0xf54] ss:$8 sps:$4 sm:$0xff]  }
 0x20c   : > { %4169 = vmatpush1.bf16.msra.mxu0 %v5667_v37  ;;  %3842 = vmatprep.subr.bf16.mxu1 %v5672_v43  ;;  %v5756_v37 = vld [vmem:[%s6195_s28 + $0x750] ss:$8 sps:$4 sm:$0xff]  }
 0x20d   : > { %4170 = vmatprep.subr.bf16.mxu0 %v5675_v44  ;;  %v5759_v43 = vld [vmem:[%s6195_s28 + $0xf50] ss:$8 sps:$4 sm:$0xff]   ;;  %v5764_v44 = vld [vmem:[%s6195_s28 + $0x764] ss:$8 sps:$4 sm:$0xff]  }
 0x20f   : > { %3843 = vmatpush1.bf16.msra.mxu1 %v5670_v25  ;;  %v5767_v25 = vld [vmem:[%s6195_s28 + $0xf64] ss:$8 sps:$4 sm:$0xff]  }
 0x210   : > { %4171 = vmatpush1.bf16.msra.mxu0 %v5673_v46  ;;  %3844 = vmatprep.subr.bf16.mxu1 %v5678_v36  ;;  %v5762_v46 = vld [vmem:[%s6195_s28 + $0x760] ss:$8 sps:$4 sm:$0xff]  }
 0x211   : > { %4172 = vmatprep.subr.bf16.mxu0 %v5681_v47  ;;  %v5765_v36 = vld [vmem:[%s6195_s28 + $0xf60] ss:$8 sps:$4 sm:$0xff]   ;;  %v5770_v47 = vld [vmem:[%s6195_s28 + $0x774] ss:$8 sps:$4 sm:$0xff]  }
 0x213   : > { %3845 = vmatpush1.bf16.msra.mxu1 %v5676_v16  ;;  %v5773_v16 = vld [vmem:[%s6195_s28 + $0xf74] ss:$8 sps:$4 sm:$0xff]  }
 0x214   : > { %4173 = vmatpush1.bf16.msra.mxu0 %v5679_v48  ;;  %3846 = vmatprep.subr.bf16.mxu1 %v5684_v50  ;;  %v5768_v48 = vld [vmem:[%s6195_s28 + $0x770] ss:$8 sps:$4 sm:$0xff]  }
 0x215   : > { %4174 = vmatprep.subr.bf16.mxu0 %v5687_v51  ;;  %v5771_v50 = vld [vmem:[%s6195_s28 + $0xf70] ss:$8 sps:$4 sm:$0xff]   ;;  %v5776_v51 = vld [vmem:[%s6195_s28 + $0x784] ss:$8 sps:$4 sm:$0xff]  }
 0x217   : > { %3847 = vmatpush1.bf16.msra.mxu1 %v5682_v53  ;;  %v5779_v53 = vld [vmem:[%s6195_s28 + $0xf84] ss:$8 sps:$4 sm:$0xff]  }
 0x218   : > { %4175 = vmatpush1.bf16.msra.mxu0 %v5685_v54  ;;  %3848 = vmatprep.subr.bf16.mxu1 %v5690_v55  ;;  %v5774_v54 = vld [vmem:[%s6195_s28 + $0x780] ss:$8 sps:$4 sm:$0xff]  }
 0x219   : > { %4176 = vmatprep.subr.bf16.mxu0 %v5693_v57  ;;  %v5777_v55 = vld [vmem:[%s6195_s28 + $0xf80] ss:$8 sps:$4 sm:$0xff]   ;;  %v5782_v57 = vld [vmem:[%s6195_s28 + $0x794] ss:$8 sps:$4 sm:$0xff]  }
 0x21b   : > { %3849 = vmatpush1.bf16.msra.mxu1 %v5688_v38  ;;  %v5785_v38 = vld [vmem:[%s6195_s28 + $0xf94] ss:$8 sps:$4 sm:$0xff]  }
 0x21c   : > { %4177 = vmatpush1.bf16.msra.mxu0 %v5691_v39  ;;  %3850 = vmatprep.subr.bf16.mxu1 %v5696_v60  ;;  %v5780_v39 = vld [vmem:[%s6195_s28 + $0x790] ss:$8 sps:$4 sm:$0xff]  }
 0x21d   : > { %4178 = vmatprep.subr.bf16.mxu0 %v5699_v61  ;;  %v5783_v60 = vld [vmem:[%s6195_s28 + $0xf90] ss:$8 sps:$4 sm:$0xff]   ;;  %v5788_v61 = vld [vmem:[%s6195_s28 + $0x7a4] ss:$8 sps:$4 sm:$0xff]  }
 0x21f   : > { %3851 = vmatpush1.bf16.msra.mxu1 %v5694_v0  ;;  %v5791_v0 = vld [vmem:[%s6195_s28 + $0xfa4] ss:$8 sps:$4 sm:$0xff]  }
 0x220   : > { %4179 = vmatpush1.bf16.msra.mxu0 %v5697_v1  ;;  %3852 = vmatprep.subr.bf16.mxu1 %v5702_v2  ;;  %v5786_v1 = vld [vmem:[%s6195_s28 + $0x7a0] ss:$8 sps:$4 sm:$0xff]  }
 0x221   : > { %4180 = vmatprep.subr.bf16.mxu0 %v5705_v3  ;;  %v5789_v2 = vld [vmem:[%s6195_s28 + $0xfa0] ss:$8 sps:$4 sm:$0xff]   ;;  %v5794_v3 = vld [vmem:[%s6195_s28 + $0x7b4] ss:$8 sps:$4 sm:$0xff]  }
 0x223   : > { %3853 = vmatpush1.bf16.msra.mxu1 %v5700_v24  ;;  %v5797_v24 = vld [vmem:[%s6195_s28 + $0xfb4] ss:$8 sps:$4 sm:$0xff]  }
 0x224   : > { %4181 = vmatpush1.bf16.msra.mxu0 %v5703_v4  ;;  %3854 = vmatprep.subr.bf16.mxu1 %v5708_v40  ;;  %v5792_v4 = vld [vmem:[%s6195_s28 + $0x7b0] ss:$8 sps:$4 sm:$0xff]  }
 0x225   : > { %4182 = vmatprep.subr.bf16.mxu0 %v5711_v41  ;;  %v5795_v40 = vld [vmem:[%s6195_s28 + $0xfb0] ss:$8 sps:$4 sm:$0xff]   ;;  %v5800_v41 = vld [vmem:[%s6195_s28 + $0x7c4] ss:$8 sps:$4 sm:$0xff]  }
 0x227   : > { %3855 = vmatpush1.bf16.msra.mxu1 %v5706_v58  ;;  %v5803_v58 = vld [vmem:[%s6195_s28 + $0xfc4] ss:$8 sps:$4 sm:$0xff]  }
 0x228   : > { %4183 = vmatpush1.bf16.msra.mxu0 %v5709_v6  ;;  %3856 = vmatprep.subr.bf16.mxu1 %v5714_v59  ;;  %v5798_v6 = vld [vmem:[%s6195_s28 + $0x7c0] ss:$8 sps:$4 sm:$0xff]  }
 0x229   : > { %4184 = vmatprep.subr.bf16.mxu0 %v5717_v7  ;;  %v5801_v59 = vld [vmem:[%s6195_s28 + $0xfc0] ss:$8 sps:$4 sm:$0xff]   ;;  %v5806_v7 = vld [vmem:[%s6195_s28 + $0x7d4] ss:$8 sps:$4 sm:$0xff]  }
 0x22b   : > { %3857 = vmatpush1.bf16.msra.mxu1 %v5712_v8  ;;  %v5809_v8 = vld [vmem:[%s6195_s28 + $0xfd4] ss:$8 sps:$4 sm:$0xff]  }
 0x22c   : > { %4185 = vmatpush1.bf16.msra.mxu0 %v5715_v9  ;;  %3858 = vmatprep.subr.bf16.mxu1 %v5720_v10  ;;  %v5804_v9 = vld [vmem:[%s6195_s28 + $0x7d0] ss:$8 sps:$4 sm:$0xff]  }
 0x22d   : > { %4186 = vmatprep.subr.bf16.mxu0 %v5723_v11  ;;  %v5807_v10 = vld [vmem:[%s6195_s28 + $0xfd0] ss:$8 sps:$4 sm:$0xff]   ;;  %v5812_v11 = vld [vmem:[%s6195_s28 + $0x7e4] ss:$8 sps:$4 sm:$0xff]  }
 0x22f   : > { %3859 = vmatpush1.bf16.msra.mxu1 %v5718_v12  ;;  %v5815_v12 = vld [vmem:[%s6195_s28 + $0xfe4] ss:$8 sps:$4 sm:$0xff]  }
 0x230   : > { %4187 = vmatpush1.bf16.msra.mxu0 %v5721_v13  ;;  %3869 = vmatprep.subr.bf16.mxu1 %v5727_v63  ;;  %v5810_v13 = vld [vmem:[%s6195_s28 + $0x7e0] ss:$8 sps:$4 sm:$0xff]  }
 0x231   : > { %4197 = vmatprep.subr.bf16.mxu0 %v5731_v15  ;;  %v5813_v63 = vld [vmem:[%s6195_s28 + $0xfe0] ss:$8 sps:$4 sm:$0xff]   ;;  %v5818_v15 = vld [vmem:[%s6195_s28 + $0x7f4] ss:$8 sps:$4 sm:$0xff]  }
 0x232   : > { %3861 = vmatmul.mubr.bf16.vlgmr.msra.gmra.mrb[0].mxu1 %v6788_v18 }
 0x233   : > { %4189 = vmatmul.mubr.bf16.vlgmr.msra.gmra.mrb[0].mxu0 %v6792_v19  ;;  %3870 = vmatpush1.bf16.msra.mxu1 %v5725_v20  ;;  %v5821_v20 = vld [vmem:[%s6195_s28 + $0xff4] ss:$8 sps:$4 sm:$0xff]  }
 0x234   : > { %4198 = vmatpush1.bf16.msra.mxu0 %v5729_v21  ;;  %3871 = vmatprep.subr.bf16.mxu1 %v5734_v22  ;;  %v5816_v21 = vld [vmem:[%s6195_s28 + $0x7f0] ss:$8 sps:$4 sm:$0xff]  }
 0x235   : > { %4199 = vmatprep.subr.bf16.mxu0 %v5737_v23  ;;  %3901 = vmatprep.mubr.bf16.mxu1 %v891_v45  ;;  %v5819_v22 = vld [vmem:[%s6195_s28 + $0xff0] ss:$8 sps:$4 sm:$0xff]   ;;  %v889_v23 = vcombine.high %v6788_v18, %v6788_v18  ;;  %v987_v45 = vcombine.high %v6792_v19, %v6792_v19 }
 0x236   : > { %4229 = vmatprep.mubr.bf16.mxu0 %v989_v52  ;;  %v782_v52 = vsub.s32 0, %v6240_v42 }
 0x237   : > { %3872 = vmatpush1.bf16.msra.mxu1 %v5732_v49  ;;  %v778_v49 = vld [vmem:[%s229_s29] sm:$0x3] }
 0x238   : > { %4200 = vmatpush1.bf16.msra.mxu0 %v5735_v5  ;;  %3873 = vmatprep.subr.bf16.mxu1 %v5740_v14  ;;  %v786_v5 = vsub.s32 1, %v6240_v42  ;;  %v783_v14 = vrot.slane %v778_v49, %v782_v52 }
 0x239   : > { %4201 = vmatprep.subr.bf16.mxu0 %v5743_v56 }
 0x23a   : > { %v787_v56 = vrot.slane %v778_v49, %v786_v5 }
 0x23b   : > { %3874 = vmatpush1.bf16.msra.mxu1 %v5738_v62 }
 0x23c   : > { %4202 = vmatpush1.bf16.msra.mxu0 %v5741_v26  ;;  %3875 = vmatprep.subr.bf16.mxu1 %v5746_v27 }
 0x23d   : > { %4203 = vmatprep.subr.bf16.mxu0 %v5749_v28 }
 0x23f   : > { %3876 = vmatpush1.bf16.msra.mxu1 %v5744_v29 }
 0x240   : > { %4204 = vmatpush1.bf16.msra.mxu0 %v5747_v30  ;;  %3877 = vmatprep.subr.bf16.mxu1 %v5752_v31 }
 0x241   : > { %4205 = vmatprep.subr.bf16.mxu0 %v5755_v32 }
 0x243   : > { %3878 = vmatpush1.bf16.msra.mxu1 %v5750_v33 }
 0x244   : > { %4206 = vmatpush1.bf16.msra.mxu0 %v5753_v34  ;;  %3879 = vmatprep.subr.bf16.mxu1 %v5758_v35 }
 0x245   : > { %4207 = vmatprep.subr.bf16.mxu0 %v5761_v17 }
 0x247   : > { %3880 = vmatpush1.bf16.msra.mxu1 %v5756_v37 }
 0x248   : > { %4208 = vmatpush1.bf16.msra.mxu0 %v5759_v43  ;;  %3881 = vmatprep.subr.bf16.mxu1 %v5764_v44 }
 0x249   : > { %4209 = vmatprep.subr.bf16.mxu0 %v5767_v25 }
 0x24b   : > { %3882 = vmatpush1.bf16.msra.mxu1 %v5762_v46 }
 0x24c   : > { %4210 = vmatpush1.bf16.msra.mxu0 %v5765_v36  ;;  %3883 = vmatprep.subr.bf16.mxu1 %v5770_v47 }
 0x24d   : > { %4211 = vmatprep.subr.bf16.mxu0 %v5773_v16 }
 0x24f   : > { %3884 = vmatpush1.bf16.msra.mxu1 %v5768_v48 }
 0x250   : > { %4212 = vmatpush1.bf16.msra.mxu0 %v5771_v50  ;;  %3885 = vmatprep.subr.bf16.mxu1 %v5776_v51 }
 0x251   : > { %4213 = vmatprep.subr.bf16.mxu0 %v5779_v53 }
 0x253   : > { %3886 = vmatpush1.bf16.msra.mxu1 %v5774_v54 }
 0x254   : > { %4214 = vmatpush1.bf16.msra.mxu0 %v5777_v55  ;;  %3887 = vmatprep.subr.bf16.mxu1 %v5782_v57 }
 0x255   : > { %4215 = vmatprep.subr.bf16.mxu0 %v5785_v38 }
 0x257   : > { %3888 = vmatpush1.bf16.msra.mxu1 %v5780_v39 }
 0x258   : > { %4216 = vmatpush1.bf16.msra.mxu0 %v5783_v60  ;;  %3889 = vmatprep.subr.bf16.mxu1 %v5788_v61 }
 0x259   : > { %4217 = vmatprep.subr.bf16.mxu0 %v5791_v0 }
 0x25b   : > { %3890 = vmatpush1.bf16.msra.mxu1 %v5786_v1 }
 0x25c   : > { %4218 = vmatpush1.bf16.msra.mxu0 %v5789_v2  ;;  %3891 = vmatprep.subr.bf16.mxu1 %v5794_v3 }
 0x25d   : > { %4219 = vmatprep.subr.bf16.mxu0 %v5797_v24 }
 0x25f   : > { %3892 = vmatpush1.bf16.msra.mxu1 %v5792_v4 }
 0x260   : > { %4220 = vmatpush1.bf16.msra.mxu0 %v5795_v40  ;;  %3893 = vmatprep.subr.bf16.mxu1 %v5800_v41 }
 0x261   : > { %4221 = vmatprep.subr.bf16.mxu0 %v5803_v58 }
 0x263   : > { %3894 = vmatpush1.bf16.msra.mxu1 %v5798_v6 }
 0x264   : > { %4222 = vmatpush1.bf16.msra.mxu0 %v5801_v59  ;;  %3895 = vmatprep.subr.bf16.mxu1 %v5806_v7 }
 0x265   : > { %4223 = vmatprep.subr.bf16.mxu0 %v5809_v8 }
 0x267   : > { %3896 = vmatpush1.bf16.msra.mxu1 %v5804_v9 }
 0x268   : > { %4224 = vmatpush1.bf16.msra.mxu0 %v5807_v10  ;;  %3897 = vmatprep.subr.bf16.mxu1 %v5812_v11 }
 0x269   : > { %4225 = vmatprep.subr.bf16.mxu0 %v5815_v12 }
 0x26b   : > { %3898 = vmatpush1.bf16.msra.mxu1 %v5810_v13 }
 0x26c   : > { %4226 = vmatpush1.bf16.msra.mxu0 %v5813_v63  ;;  %3899 = vmatprep.subr.bf16.mxu1 %v5818_v15 }
 0x26d   : > { %4227 = vmatprep.subr.bf16.mxu0 %v5821_v20 }
 0x26f   : > { %3900 = vmatpush1.bf16.msra.mxu1 %v5816_v21 }
 0x270   : > { %4228 = vmatpush1.bf16.msra.mxu0 %v5819_v22 }
 0x272   : > { %3902 = vmatmul.mubr.bf16.vlgmr.msra.gmra.mrb[0].mxu1 %v889_v23 }
 0x273   : > { %4230 = vmatmul.mubr.bf16.vlgmr.msra.gmra.mrb[0].mxu0 %v987_v45 }
 0x345   : > { %v3903_v62 = vpop.f32.mrb[0].mxu1 }
 0x346   : > { %v4231_v26 = vpop.f32.mrb[0].mxu0  ;;  %v4931_v27 = vadd.f32 %v3903_v62, %v783_v14  ;;  %v3905_v18 = vpop.f32.mrb[1].mxu1 }
 0x347   : > { %v4233_v28 = vpop.f32.mrb[1].mxu0  ;;  %v4933_v29 = vadd.f32 %v3905_v18, %v787_v56  ;;  %v3907_v19 = vpop.f32.mrb[2].mxu1 }
 0x348   : > { %v4235_v30 = vpop.f32.mrb[2].mxu0  ;;  %v4932_v31 = vadd.f32 %v4931_v27, %v4231_v26  ;;  %v3908_v32 = vpop.f32.mrb[3].mxu1 }
 0x349   : > { %v4236_v33 = vpop.f32.mrb[3].mxu0  ;;  %v4934_v34 = vadd.f32 %v4933_v29, %v4233_v28 }
 0x34a   : > { %v4238_v35 = vmax.f32 %v4932_v31, 0.0 }
 0x34b   : > { %v4239_v17 = vmax.f32 %v4934_v34, 0.0 }
 0x34c   : > { %v4240_v42 = vmul.f32 %v4238_v35, %v4238_v35 }
 0x34d   : > { %v4241_v37 = vmul.f32 %v4239_v17, %v4239_v17 }
 0x34e   : > { %v4243_v43 = vsel %vm4242_vm0, %v4240_v42, 0.0 }
 0x34f   : > { %v4244_v44 = vsel %vm4242_vm0, %v4241_v37, 0.0 }
 0x350   : > { %v4245_v25 = vadd.f32 %v4244_v44, %v4243_v43 }
 0x352   : > { %4246 = vadd.xlane.f32.xlu0 %v4245_v25 }
 0x3df   : > { %v4247_v46 = vpop.xlane.xlu0 %4246 }
 0x3e0   : > { %v4248_v36 = vmax.f32 %v4247_v46, 1e-24 }
 0x3e2   : > { %5822 = vrsqrt.f32 %v4248_v36 }
 0x3ec   : > { %v5823_v47 = vpop.eup %5822 }
 0x3ed   : > { %v4250_v16 = vmul.f32 %v5823_v47, %v4238_v35  ;;  %v4251_v48 = vmul.f32 %v5823_v47, %v4239_v17 }
 0x3ef   : > { %v4254_v50 = vcombine.low %v4250_v16, %v4251_v48 }
 0x3f1   : > { %4921 = vst.sshfl [vmem:[%s261_s9] sm:$0x33 pattern:$0x76325410] %v4254_v50 }
 0x3f2   : > { %5927 = shalt.err (!%p5924_p10)
}
 0x3f3   : > { %s5928_s10 = scalar_lea.hbm %s6874_s17, 64  ;;  %s5932_s19 = scalar_lea.hbm %s6921_s3, 128 }
 0x3f4   : > { %p5929_p11 = scmp.ne.s32.totalorder %s6874_s17, %s5928_s10  ;;  %p5933_p5 = scmp.lt.u32.totalorder %s6874_s17, %s6921_s3 }
 0x3f5   : > { %p5934_p1 = scmp.lt.u32.totalorder %s5932_s19, %s5928_s10  ;;  %p5936_p2 = scmp.lt.u32.totalorder %s5928_s10, %s6874_s17 }
 0x3f6   : > { %p5930_p4 = pnand %p5929_p11, %p6935_p7 }
 0x3f7   : > { %p5935_p13 = por %p5934_p1, %p5933_p5 }
 0x3f8   : > { %p5931_p3 = pneg %p5930_p4 }
 0x3f9   : > { %p5937_p9 = por %p5936_p2, %p5935_p13 }
 0x3fb   : > { %p5938_p6 = pnand %p5937_p9, %p5931_p3 }
 0x3fd   : > { %5941 = shalt.err (!%p5938_p6)
}
 0x3fe   : > { %4997 = dma.vmem_to_hbm [thread:$0]  (%p6935_p7), %s6876_s4, 64, %s6874_s17, %s4265_s20  }
 0x3ff PF: > { %s4291_s29 = sand.u32 1, %s5972_s12   ;;  %p6936_p12 = scmp.ne.s32.totalorder %s6927_s24, 0 }
 0x400   : > { %p6937_p0 = scmp.ge.s32.totalorder %s5984_s15, 2  ;;  %s4292_s30 = scalar_lea.sflag [#allocation4], %s4291_s29 }
 0x402   : > { %p5010_p8 = pnand %p6937_p0, %p6936_p12 }
 0x404   : > { %5967 = dma.done.wait (!%p5010_p8), %s4292_s30, 64  }
 0x405   : > { %5969 = vsyncadd (!%p5010_p8), %s4292_s30, 4294967232  ;;  %p19_p10 = scmp.ge.s32.totalorder %s6038_s18, 4   ;;  %s6938_s12 = smov %s5976_s13 }
 0x406   : > { %s6939_s13 = smov %s5980_s14  ;;  %s6940_s14 = smov %s6050_s21 }
 0x407   : > { %s6941_s15 = smov %s6038_s18  ;;  %21 = sbr.rel (!%p19_p10) target bundleno = 7 (0x7), region = 101 }
 0x40e   :  { %4297 = vsyncpa [#allocation3], 1 }
 0x40f   :  { %4299 = vsyncpa [#allocation3 + $0x1], 1 }
 0x410   :  { %4300 = vsyncpa [#allocation6], 1 }
 0x411   :  { %4302 = vsyncpa [#allocation6 + $0x1], 1 }
 0x412   :  { %4303 = vsyncpa [#allocation4], 1 }
 0x413   :  { %4305 = vsyncpa [#allocation4 + $0x1], 1 }

</bundles_post_ra>
